<compile_context>
chip_gen: v7x
topology: tpu7x:2x2x1
jax: 0.10.0
libtpu: 0.0.40
codegen_flags: <defaults>
</compile_context>

<pallas_src>
from functools import partial

import jax
import jax.numpy as jnp
import numpy as np
from jax.experimental import pallas as pl
from jax.experimental.pallas import tpu as pltpu

NEG_SLOPE = 0.01   # nn.LeakyReLU default negative_slope
BN_EPS = 1e-5      # nn.BatchNorm2d default eps


def _round_up(x, m):
    return (x + m - 1) // m * m


# --------------------- shared in-kernel 3x3 conv tile ----------------------- #
def _conv_tile(x_ref, w_ref):
    """3x3 'same' conv on one halo'd row tile.

    x_ref: (1, tile_h+2, Wp+2, Cin) bf16 (1-px halo on H and W).
    w_ref: (9, Cin, Cout_pad) bf16.
    Returns f32 (tile_h*Wp, Cout_pad) accumulator (9 shifted MXU dots).
    """
    th = x_ref.shape[1] - 2
    wp = x_ref.shape[2] - 2
    cin = x_ref.shape[3]
    cout_pad = w_ref.shape[-1]
    rows = th * wp

    # f32 detour for the shifted slices (avoids packed-bf16 odd-offset sublane
    # slicing); operands are cast back to bf16 right before the MXU dot.
    x = x_ref[...].astype(jnp.float32)                       # (1, th+2, wp+2, cin)

    acc = jnp.zeros((rows, cout_pad), jnp.float32)
    for ky in range(3):
        for kx in range(3):
            xin = x[0, ky:ky + th, kx:kx + wp, :].reshape(rows, cin)
            acc = acc + jnp.dot(xin.astype(jnp.bfloat16), w_ref[ky * 3 + kx],
                                preferred_element_type=jnp.float32)
    return acc


# ------------------------- Pallas kernel: pass 1 --------------------------- #
def _conv_stats_kernel(x_ref, w_ref, stats_ref, *, num_h_tiles, hp, tile_h, wp):
    """Conv on one tile -> per-tile per-channel sum / sum-of-squares only.

    The conv output itself is NOT stored (pass 2 recomputes it), so no f32
    intermediate ever touches HBM.
    """
    acc = _conv_tile(x_ref, w_ref)

    if hp % tile_h != 0:
        # Only when Hp is padded up to the row tile: the halo makes padded
        # output rows nonzero, so mask them out of the batch statistics.
        base = (pl.program_id(0) % num_h_tiles) * tile_h
        n_valid = jnp.clip(hp - base, 0, tile_h) * wp
        ridx = jax.lax.broadcasted_iota(jnp.int32, (acc.shape[0], 1), 0)
        acc = jnp.where(ridx < n_valid, acc, 0.0)

    s = jnp.sum(acc, axis=0, keepdims=True)                  # (1, Cout_pad)
    ss = jnp.sum(acc * acc, axis=0, keepdims=True)
    stats_ref[...] = jnp.concatenate([s, ss], axis=0)[None]  # (1, 2, Cout_pad)


# ------------------------- Pallas kernel: pass 2 --------------------------- #
def _conv_bn_act_kernel(x_ref, w_ref, scale_ref, shift_ref, o_ref):
    """Recompute conv on the tile, apply fused BN scale/shift + LeakyReLU."""
    acc = _conv_tile(x_ref, w_ref)
    y = acc * scale_ref[...] + shift_ref[...]
    o_ref[...] = jnp.where(y >= 0, y, NEG_SLOPE * y).astype(o_ref.dtype)


# ------------------------------ JAX glue ----------------------------------- #
def unet_down_forward(x_nchw, params, *, target_tile_rows=2048):
    """x_nchw: (N, Cin, H, W) float32 -> (N, Cout, H//2, W//2) float32."""
    w, gamma, beta = params["w"], params["gamma"], params["beta"]
    # NOTE: params["b"] (conv bias) is intentionally NOT used.  A per-channel
    # constant added before training-mode BatchNorm cancels exactly (mean
    # shifts by b, variance unchanged), so the output is mathematically
    # identical without it -- and padded rows stay exact zeros.
    N, Cin, H, W = x_nchw.shape
    kh, kw, _, Cout = w.shape
    Hp, Wp = H // 2, W // 2                                  # floor, like MaxPool2d(2)

    # --- NCHW -> NHWC, MaxPool2d(2), cast to bf16 BEFORE any materialization ---
    x_nhwc = jnp.transpose(x_nchw, (0, 2, 3, 1))
    x_nhwc = x_nhwc[:, :Hp * 2, :Wp * 2, :]                  # floor crop for odd H/W
    pooled = x_nhwc.reshape(N, Hp, 2, Wp, 2, Cin).max(axis=(2, 4))   # (N,Hp,Wp,Cin)
    pooled = pooled.astype(jnp.bfloat16)

    # --- lane-dense Cout padding (256-wide tiles for v6e/v7x MXU when large) ---
    lane = 256 if Cout >= 256 else 128
    Cout_pad = _round_up(Cout, lane)

    # --- balanced, multiple-of-8 row tiles sized against a v7x-safe VMEM budget ---
    tile_h = max(8, min(_round_up(Hp, 8), (target_tile_rows // max(Wp, 1)) // 8 * 8))
    num_h = -(-Hp // tile_h)
    tile_h = _round_up(-(-Hp // num_h), 8)                   # balance work across tiles

    def footprint(th):
        rows = th * Wp
        halo = (th + 2) * (Wp + 2) * Cin
        return (2 * halo * 2                   # bf16 input tile, double-buffered
                + halo * 4                     # in-kernel f32 copy of the tile
                + 2 * 9 * Cin * Cout_pad * 2   # resident bf16 weight (x2 safety)
                + 2 * rows * Cout_pad * 4      # pass-2 f32 output tile, double-buffered
                + rows * Cout_pad * 4          # f32 accumulator
                + 8 * Cout_pad * 4)            # stats / scale / shift vectors

    VMEM_BUDGET = 24 * 1024 * 1024             # keeps us well inside v7x's 64 MiB
    while footprint(tile_h) > VMEM_BUDGET and tile_h > 8:
        tile_h -= 8
    # TODO(synk): add a W-tiling axis for extremely wide images (Wp*8 rows too big).
    num_h = -(-Hp // tile_h)
    Hp_pad = num_h * tile_h
    tile_rows = tile_h * Wp
    T = N * num_h
    NP = N * Hp * Wp                                         # true element count for BN

    # --- halo'd row tiles: (N*num_h, tile_h+2, Wp+2, Cin) bf16 ---
    # Duplication is only the 2 halo rows per tile (vs 9x for im2col).
    # TODO(synk): replace the wrapper-side stacking with an Element-indexed
    # (overlapping) BlockSpec on the padded tensor to drop even this halo copy.
    pp = jnp.pad(pooled, ((0, 0), (1, 1 + Hp_pad - Hp), (1, 1), (0, 0)))
    x_tiles = jnp.stack([pp[:, t * tile_h:t * tile_h + tile_h + 2]
                         for t in range(num_h)], axis=1)
    x_tiles = x_tiles.reshape(T, tile_h + 2, Wp + 2, Cin)

    # --- weights: (3,3,Cin,Cout) HWIO -> (9, Cin, Cout_pad) bf16, resident ---
    # TODO(synk): for very large Cin*Cout_pad weights on v7x, add a K-reduction
    # grid axis with a VMEM accumulator instead of keeping the weight resident.
    w9 = w.reshape(9, Cin, Cout).astype(jnp.float32)
    w9 = jnp.pad(w9, ((0, 0), (0, 0), (0, Cout_pad - Cout))).astype(jnp.bfloat16)

    cparams = pltpu.CompilerParams(
        dimension_semantics=("parallel",),      # megacore-shardable tile axis
        vmem_limit_bytes=int(min(max(2 * footprint(tile_h), 16 * 1024 * 1024),
                                 56 * 1024 * 1024)),
    )

    # --- pass 1: conv + per-tile BN partial sums (no conv intermediate in HBM) ---
    stats = pl.pallas_call(
        partial(_conv_stats_kernel, num_h_tiles=num_h, hp=Hp, tile_h=tile_h, wp=Wp),
        out_shape=jax.ShapeDtypeStruct((T, 2, Cout_pad), jnp.float32),
        grid=(T,),
        in_specs=[
            pl.BlockSpec((1, tile_h + 2, Wp + 2, Cin), lambda i: (i, 0, 0, 0)),
            pl.BlockSpec((9, Cin, Cout_pad), lambda i: (0, 0, 0)),
        ],
        out_specs=pl.BlockSpec((1, 2, Cout_pad), lambda i: (i, 0, 0)),
        compiler_params=cparams,
        cost_estimate=pl.CostEstimate(
            flops=2 * T * tile_rows * 9 * Cin * Cout_pad,
            transcendentals=0,
            bytes_accessed=x_tiles.size * 2 + w9.size * 2 + T * 2 * Cout_pad * 4),
    )(x_tiles, w9)

    # --- tiny XLA reduction: batch mean / biased var -> fused BN scale & shift ---
    s = jnp.sum(stats[:, 0, :], axis=0)
    ss = jnp.sum(stats[:, 1, :], axis=0)
    mean = s / NP
    # NOTE: E[x^2]-E[x]^2 in f32 (clamped at 0).  Adequate at the 2e-2 tolerance;
    # weakest numerical link if conv outputs develop a large per-channel offset.
    var = jnp.maximum(ss / NP - mean * mean, 0.0)
    g = jnp.pad(gamma.astype(jnp.float32), (0, Cout_pad - Cout), constant_values=1.0)
    be = jnp.pad(beta.astype(jnp.float32), (0, Cout_pad - Cout))
    scale_v = g * jax.lax.rsqrt(var + BN_EPS)
    shift_v = be - mean * scale_v
    scale = scale_v.reshape(1, Cout_pad)
    shift = shift_v.reshape(1, Cout_pad)

    # --- pass 2: recompute conv (K = 9*Cin, cheap) + BN scale/shift + LeakyReLU ---
    out2d = pl.pallas_call(
        _conv_bn_act_kernel,
        out_shape=jax.ShapeDtypeStruct((T * tile_rows, Cout_pad), jnp.float32),
        grid=(T,),
        in_specs=[
            pl.BlockSpec((1, tile_h + 2, Wp + 2, Cin), lambda i: (i, 0, 0, 0)),
            pl.BlockSpec((9, Cin, Cout_pad), lambda i: (0, 0, 0)),
            pl.BlockSpec((1, Cout_pad), lambda i: (0, 0)),
            pl.BlockSpec((1, Cout_pad), lambda i: (0, 0)),
        ],
        out_specs=pl.BlockSpec((tile_rows, Cout_pad), lambda i: (i, 0)),
        compiler_params=cparams,
        cost_estimate=pl.CostEstimate(
            flops=2 * T * tile_rows * 9 * Cin * Cout_pad + 4 * T * tile_rows * Cout_pad,
            transcendentals=0,
            bytes_accessed=(x_tiles.size * 2 + w9.size * 2 + 4 * Cout_pad * 4
                            + T * tile_rows * Cout_pad * 4)),
    )(x_tiles, w9, scale, shift)

    # --- strip H/channel padding; NCHW out to match the PyTorch contract ---
    # TODO(synk): return NHWC (optionally bf16) when chaining UNet layers to save
    # the transpose's extra HBM pass.
    out = out2d.reshape(N, Hp_pad, Wp, Cout_pad)[:, :Hp, :, :Cout]
    return jnp.transpose(out, (0, 3, 1, 2))


# --------------------------- pure-JAX reference ----------------------------- #
def reference(x_nchw, params):
    w, b, gamma, beta = params["w"], params["b"], params["gamma"], params["beta"]
    xp = jax.lax.reduce_window(x_nchw, -jnp.inf, jax.lax.max,
                               (1, 1, 2, 2), (1, 1, 2, 2), "VALID")
    y = jax.lax.conv_general_dilated(
        xp, w, window_strides=(1, 1), padding=((1, 1), (1, 1)),
        dimension_numbers=("NCHW", "HWIO", "NCHW"))
    y = y + b.reshape(1, -1, 1, 1)
    mean = y.mean(axis=(0, 2, 3), keepdims=True)
    var = ((y - mean) ** 2).mean(axis=(0, 2, 3), keepdims=True)
    y = (y - mean) / jnp.sqrt(var + BN_EPS)
    y = y * gamma.reshape(1, -1, 1, 1) + beta.reshape(1, -1, 1, 1)
    return jnp.where(y >= 0, y, NEG_SLOPE * y)


# --------------------------------- main ------------------------------------ #
if __name__ == "__main__":
    key = jax.random.PRNGKey(0)
    k_x, k_w, k_b = jax.random.split(key, 3)

    N, Cin, Cout, H, W = 2, 4, 8, 16, 16
    x = jax.random.normal(k_x, (N, Cin, H, W), dtype=jnp.float32)

    params = {
        # conv weight in HWIO layout (3, 3, Cin, Cout)
        "w": 0.1 * jax.random.normal(k_w, (3, 3, Cin, Cout), dtype=jnp.float32),
        # conv bias: used by the reference, mathematically cancelled by the
        # kernel's training-mode BatchNorm (so results must still match).
        "b": 0.05 * jax.random.normal(k_b, (Cout,), dtype=jnp.float32),
        # BatchNorm affine params (perturbed from gamma=1/beta=0 so the affine
        # path is exercised)
        "gamma": 1.0 + 0.05 * jnp.arange(Cout, dtype=jnp.float32),
        "beta": 0.02 * jnp.arange(Cout, dtype=jnp.float32),
    }

    fwd = jax.jit(unet_down_forward)
    out = jax.block_until_ready(fwd(x, params))

    ref = jax.block_until_ready(reference(x, params))
    assert out.shape == (N, Cout, H // 2, W // 2), out.shape
    # Tolerance accounts for bf16 MXU operands (accumulation and BN stats are f32).
    np.testing.assert_allclose(np.asarray(out), np.asarray(ref), rtol=2e-2, atol=2e-2)

    print("KERNEL_OK")
</pallas_src>

<mosaic_0001>
module attributes {stable_mosaic.version = 11 : i64} {
  func.func @_conv_stats_kernel(%arg0: i32, %arg1: memref<1x10x10x4xbf16, #tpu.memory_space<vmem>>, %arg2: memref<9x4x128xbf16, #tpu.memory_space<vmem>>, %arg3: memref<1x2x128xf32, #tpu.memory_space<vmem>>) attributes {dimension_semantics = [#tpu.dimension_semantics<parallel>], iteration_bounds = array<i64: 2>, scalar_prefetch = 0 : i64, scratch_operands = 0 : i64, tpu.core_type = #tpu.core_type<tc>, window_params = [{transform_indices = @transform_0, window_bounds = array<i64: 1, 10, 10, 4>}, {pipeline_mode = #tpu.pipeline_mode<synchronous>, transform_indices = @transform_1, window_bounds = array<i64: 9, 4, 128>}, {transform_indices = @transform_2, window_bounds = array<i64: 1, 2, 128>}]} {
    %c0 = arith.constant 0 : index
    %c0_0 = arith.constant 0 : index
    %c0_1 = arith.constant 0 : index
    %c0_2 = arith.constant 0 : index
    %0 = vector.load %arg1[%c0, %c0_0, %c0_1, %c0_2] : memref<1x10x10x4xbf16, #tpu.memory_space<vmem>>, vector<1x10x10x4xbf16>
    %1 = arith.extf %0 : vector<1x10x10x4xbf16> to vector<1x10x10x4xf32>
    %cst = arith.constant 0.000000e+00 : f32
    %2 = vector.broadcast %cst : f32 to vector<64x128xf32>
    %3 = vector.extract_strided_slice %1 {offsets = [0, 0, 0, 0], sizes = [1, 8, 8, 4], strides = [1, 1, 1, 1]} : vector<1x10x10x4xf32> to vector<1x8x8x4xf32>
    %4 = vector.shape_cast %3 : vector<1x8x8x4xf32> to vector<8x8x4xf32>
    %5 = vector.shape_cast %4 : vector<8x8x4xf32> to vector<64x4xf32>
    %6 = arith.truncf %5 : vector<64x4xf32> to vector<64x4xbf16>
    %c0_3 = arith.constant 0 : index
    %c0_4 = arith.constant 0 : index
    %c0_5 = arith.constant 0 : index
    %7 = vector.load %arg2[%c0_3, %c0_4, %c0_5] : memref<9x4x128xbf16, #tpu.memory_space<vmem>>, vector<1x4x128xbf16>
    %8 = vector.shape_cast %7 : vector<1x4x128xbf16> to vector<4x128xbf16>
    %cst_6 = arith.constant dense<0.000000e+00> : vector<64x128xf32>
    %9 = tpu.matmul %6, %8, %cst_6 {dimension_numbers = #tpu.dot_dimension_numbers<[1], [0], [0], [1], [0, 0, 1, 1], [], []>} : vector<64x4xbf16>, vector<4x128xbf16>, vector<64x128xf32> -> vector<64x128xf32>
    %10 = arith.addf %2, %9 : vector<64x128xf32>
    %11 = vector.extract_strided_slice %1 {offsets = [0, 0, 1, 0], sizes = [1, 8, 8, 4], strides = [1, 1, 1, 1]} : vector<1x10x10x4xf32> to vector<1x8x8x4xf32>
    %12 = vector.shape_cast %11 : vector<1x8x8x4xf32> to vector<8x8x4xf32>
    %13 = vector.shape_cast %12 : vector<8x8x4xf32> to vector<64x4xf32>
    %14 = arith.truncf %13 : vector<64x4xf32> to vector<64x4xbf16>
    %c1 = arith.constant 1 : index
    %c0_7 = arith.constant 0 : index
    %c0_8 = arith.constant 0 : index
    %15 = vector.load %arg2[%c1, %c0_7, %c0_8] : memref<9x4x128xbf16, #tpu.memory_space<vmem>>, vector<1x4x128xbf16>
    %16 = vector.shape_cast %15 : vector<1x4x128xbf16> to vector<4x128xbf16>
    %cst_9 = arith.constant dense<0.000000e+00> : vector<64x128xf32>
    %17 = tpu.matmul %14, %16, %cst_9 {dimension_numbers = #tpu.dot_dimension_numbers<[1], [0], [0], [1], [0, 0, 1, 1], [], []>} : vector<64x4xbf16>, vector<4x128xbf16>, vector<64x128xf32> -> vector<64x128xf32>
    %18 = arith.addf %10, %17 : vector<64x128xf32>
    %19 = vector.extract_strided_slice %1 {offsets = [0, 0, 2, 0], sizes = [1, 8, 8, 4], strides = [1, 1, 1, 1]} : vector<1x10x10x4xf32> to vector<1x8x8x4xf32>
    %20 = vector.shape_cast %19 : vector<1x8x8x4xf32> to vector<8x8x4xf32>
    %21 = vector.shape_cast %20 : vector<8x8x4xf32> to vector<64x4xf32>
    %22 = arith.truncf %21 : vector<64x4xf32> to vector<64x4xbf16>
    %c2 = arith.constant 2 : index
    %c0_10 = arith.constant 0 : index
    %c0_11 = arith.constant 0 : index
    %23 = vector.load %arg2[%c2, %c0_10, %c0_11] : memref<9x4x128xbf16, #tpu.memory_space<vmem>>, vector<1x4x128xbf16>
    %24 = vector.shape_cast %23 : vector<1x4x128xbf16> to vector<4x128xbf16>
    %cst_12 = arith.constant dense<0.000000e+00> : vector<64x128xf32>
    %25 = tpu.matmul %22, %24, %cst_12 {dimension_numbers = #tpu.dot_dimension_numbers<[1], [0], [0], [1], [0, 0, 1, 1], [], []>} : vector<64x4xbf16>, vector<4x128xbf16>, vector<64x128xf32> -> vector<64x128xf32>
    %26 = arith.addf %18, %25 : vector<64x128xf32>
    %27 = vector.extract_strided_slice %1 {offsets = [0, 1, 0, 0], sizes = [1, 8, 8, 4], strides = [1, 1, 1, 1]} : vector<1x10x10x4xf32> to vector<1x8x8x4xf32>
    %28 = vector.shape_cast %27 : vector<1x8x8x4xf32> to vector<8x8x4xf32>
    %29 = vector.shape_cast %28 : vector<8x8x4xf32> to vector<64x4xf32>
    %30 = arith.truncf %29 : vector<64x4xf32> to vector<64x4xbf16>
    %c3 = arith.constant 3 : index
    %c0_13 = arith.constant 0 : index
    %c0_14 = arith.constant 0 : index
    %31 = vector.load %arg2[%c3, %c0_13, %c0_14] : memref<9x4x128xbf16, #tpu.memory_space<vmem>>, vector<1x4x128xbf16>
    %32 = vector.shape_cast %31 : vector<1x4x128xbf16> to vector<4x128xbf16>
    %cst_15 = arith.constant dense<0.000000e+00> : vector<64x128xf32>
    %33 = tpu.matmul %30, %32, %cst_15 {dimension_numbers = #tpu.dot_dimension_numbers<[1], [0], [0], [1], [0, 0, 1, 1], [], []>} : vector<64x4xbf16>, vector<4x128xbf16>, vector<64x128xf32> -> vector<64x128xf32>
    %34 = arith.addf %26, %33 : vector<64x128xf32>
    %35 = vector.extract_strided_slice %1 {offsets = [0, 1, 1, 0], sizes = [1, 8, 8, 4], strides = [1, 1, 1, 1]} : vector<1x10x10x4xf32> to vector<1x8x8x4xf32>
    %36 = vector.shape_cast %35 : vector<1x8x8x4xf32> to vector<8x8x4xf32>
    %37 = vector.shape_cast %36 : vector<8x8x4xf32> to vector<64x4xf32>
    %38 = arith.truncf %37 : vector<64x4xf32> to vector<64x4xbf16>
    %c4 = arith.constant 4 : index
    %c0_16 = arith.constant 0 : index
    %c0_17 = arith.constant 0 : index
    %39 = vector.load %arg2[%c4, %c0_16, %c0_17] : memref<9x4x128xbf16, #tpu.memory_space<vmem>>, vector<1x4x128xbf16>
    %40 = vector.shape_cast %39 : vector<1x4x128xbf16> to vector<4x128xbf16>
    %cst_18 = arith.constant dense<0.000000e+00> : vector<64x128xf32>
    %41 = tpu.matmul %38, %40, %cst_18 {dimension_numbers = #tpu.dot_dimension_numbers<[1], [0], [0], [1], [0, 0, 1, 1], [], []>} : vector<64x4xbf16>, vector<4x128xbf16>, vector<64x128xf32> -> vector<64x128xf32>
    %42 = arith.addf %34, %41 : vector<64x128xf32>
    %43 = vector.extract_strided_slice %1 {offsets = [0, 1, 2, 0], sizes = [1, 8, 8, 4], strides = [1, 1, 1, 1]} : vector<1x10x10x4xf32> to vector<1x8x8x4xf32>
    %44 = vector.shape_cast %43 : vector<1x8x8x4xf32> to vector<8x8x4xf32>
    %45 = vector.shape_cast %44 : vector<8x8x4xf32> to vector<64x4xf32>
    %46 = arith.truncf %45 : vector<64x4xf32> to vector<64x4xbf16>
    %c5 = arith.constant 5 : index
    %c0_19 = arith.constant 0 : index
    %c0_20 = arith.constant 0 : index
    %47 = vector.load %arg2[%c5, %c0_19, %c0_20] : memref<9x4x128xbf16, #tpu.memory_space<vmem>>, vector<1x4x128xbf16>
    %48 = vector.shape_cast %47 : vector<1x4x128xbf16> to vector<4x128xbf16>
    %cst_21 = arith.constant dense<0.000000e+00> : vector<64x128xf32>
    %49 = tpu.matmul %46, %48, %cst_21 {dimension_numbers = #tpu.dot_dimension_numbers<[1], [0], [0], [1], [0, 0, 1, 1], [], []>} : vector<64x4xbf16>, vector<4x128xbf16>, vector<64x128xf32> -> vector<64x128xf32>
    %50 = arith.addf %42, %49 : vector<64x128xf32>
    %51 = vector.extract_strided_slice %1 {offsets = [0, 2, 0, 0], sizes = [1, 8, 8, 4], strides = [1, 1, 1, 1]} : vector<1x10x10x4xf32> to vector<1x8x8x4xf32>
    %52 = vector.shape_cast %51 : vector<1x8x8x4xf32> to vector<8x8x4xf32>
    %53 = vector.shape_cast %52 : vector<8x8x4xf32> to vector<64x4xf32>
    %54 = arith.truncf %53 : vector<64x4xf32> to vector<64x4xbf16>
    %c6 = arith.constant 6 : index
    %c0_22 = arith.constant 0 : index
    %c0_23 = arith.constant 0 : index
    %55 = vector.load %arg2[%c6, %c0_22, %c0_23] : memref<9x4x128xbf16, #tpu.memory_space<vmem>>, vector<1x4x128xbf16>
    %56 = vector.shape_cast %55 : vector<1x4x128xbf16> to vector<4x128xbf16>
    %cst_24 = arith.constant dense<0.000000e+00> : vector<64x128xf32>
    %57 = tpu.matmul %54, %56, %cst_24 {dimension_numbers = #tpu.dot_dimension_numbers<[1], [0], [0], [1], [0, 0, 1, 1], [], []>} : vector<64x4xbf16>, vector<4x128xbf16>, vector<64x128xf32> -> vector<64x128xf32>
    %58 = arith.addf %50, %57 : vector<64x128xf32>
    %59 = vector.extract_strided_slice %1 {offsets = [0, 2, 1, 0], sizes = [1, 8, 8, 4], strides = [1, 1, 1, 1]} : vector<1x10x10x4xf32> to vector<1x8x8x4xf32>
    %60 = vector.shape_cast %59 : vector<1x8x8x4xf32> to vector<8x8x4xf32>
    %61 = vector.shape_cast %60 : vector<8x8x4xf32> to vector<64x4xf32>
    %62 = arith.truncf %61 : vector<64x4xf32> to vector<64x4xbf16>
    %c7 = arith.constant 7 : index
    %c0_25 = arith.constant 0 : index
    %c0_26 = arith.constant 0 : index
    %63 = vector.load %arg2[%c7, %c0_25, %c0_26] : memref<9x4x128xbf16, #tpu.memory_space<vmem>>, vector<1x4x128xbf16>
    %64 = vector.shape_cast %63 : vector<1x4x128xbf16> to vector<4x128xbf16>
    %cst_27 = arith.constant dense<0.000000e+00> : vector<64x128xf32>
    %65 = tpu.matmul %62, %64, %cst_27 {dimension_numbers = #tpu.dot_dimension_numbers<[1], [0], [0], [1], [0, 0, 1, 1], [], []>} : vector<64x4xbf16>, vector<4x128xbf16>, vector<64x128xf32> -> vector<64x128xf32>
    %66 = arith.addf %58, %65 : vector<64x128xf32>
    %67 = vector.extract_strided_slice %1 {offsets = [0, 2, 2, 0], sizes = [1, 8, 8, 4], strides = [1, 1, 1, 1]} : vector<1x10x10x4xf32> to vector<1x8x8x4xf32>
    %68 = vector.shape_cast %67 : vector<1x8x8x4xf32> to vector<8x8x4xf32>
    %69 = vector.shape_cast %68 : vector<8x8x4xf32> to vector<64x4xf32>
    %70 = arith.truncf %69 : vector<64x4xf32> to vector<64x4xbf16>
    %c8 = arith.constant 8 : index
    %c0_28 = arith.constant 0 : index
    %c0_29 = arith.constant 0 : index
    %71 = vector.load %arg2[%c8, %c0_28, %c0_29] : memref<9x4x128xbf16, #tpu.memory_space<vmem>>, vector<1x4x128xbf16>
    %72 = vector.shape_cast %71 : vector<1x4x128xbf16> to vector<4x128xbf16>
    %cst_30 = arith.constant dense<0.000000e+00> : vector<64x128xf32>
    %73 = tpu.matmul %70, %72, %cst_30 {dimension_numbers = #tpu.dot_dimension_numbers<[1], [0], [0], [1], [0, 0, 1, 1], [], []>} : vector<64x4xbf16>, vector<4x128xbf16>, vector<64x128xf32> -> vector<64x128xf32>
    %74 = arith.addf %66, %73 : vector<64x128xf32>
    %cst_31 = arith.constant dense<0.000000e+00> : vector<128xf32>
    %75 = vector.multi_reduction <add>, %74, %cst_31 [0] : vector<64x128xf32> to vector<128xf32>
    %76 = vector.shape_cast %75 : vector<128xf32> to vector<1x128xf32>
    %77 = arith.mulf %74, %74 : vector<64x128xf32>
    %cst_32 = arith.constant dense<0.000000e+00> : vector<128xf32>
    %78 = vector.multi_reduction <add>, %77, %cst_32 [0] : vector<64x128xf32> to vector<128xf32>
    %79 = vector.shape_cast %78 : vector<128xf32> to vector<1x128xf32>
    %80 = tpu.concatenate %76, %79 in 0 : vector<1x128xf32>, vector<1x128xf32> -> vector<2x128xf32>
    %81 = vector.shape_cast %80 : vector<2x128xf32> to vector<1x2x128xf32>
    %c0_33 = arith.constant 0 : index
    %c0_34 = arith.constant 0 : index
    %c0_35 = arith.constant 0 : index
    %82 = vector.load %arg3[%c0_33, %c0_34, %c0_35] : memref<1x2x128xf32, #tpu.memory_space<vmem>>, vector<1x2x128xf32>
    tpu.vector_store %arg3[%c0_33, %c0_34, %c0_35], %81 {strides = array<i32>} : memref<1x2x128xf32, #tpu.memory_space<vmem>>, vector<1x2x128xf32>,
    return
  }
  func.func @transform_0(%arg0: i32) -> (i32, i32, i32, i32) {
    %c0_i32 = arith.constant 0 : i32
    %c0_i32_0 = arith.constant 0 : i32
    %c0_i32_1 = arith.constant 0 : i32
    %c0_i32_2 = arith.constant 0 : i32
    return %arg0, %c0_i32, %c0_i32_0, %c0_i32_1 : i32, i32, i32, i32
  }
  func.func @transform_1(%arg0: i32) -> (i32, i32, i32) {
    %c0_i32 = arith.constant 0 : i32
    %c0_i32_0 = arith.constant 0 : i32
    %c0_i32_1 = arith.constant 0 : i32
    %c0_i32_2 = arith.constant 0 : i32
    return %c0_i32, %c0_i32_0, %c0_i32_1 : i32, i32, i32
  }
  func.func @transform_2(%arg0: i32) -> (i32, i32, i32) {
    %c0_i32 = arith.constant 0 : i32
    %c0_i32_0 = arith.constant 0 : i32
    %c0_i32_1 = arith.constant 0 : i32
    return %arg0, %c0_i32, %c0_i32_0 : i32, i32, i32
  }
}

module attributes {stable_mosaic.version = 11 : i64} {
  func.func @_conv_bn_act_kernel(%arg0: i32, %arg1: memref<1x10x10x4xbf16, #tpu.memory_space<vmem>>, %arg2: memref<9x4x128xbf16, #tpu.memory_space<vmem>>, %arg3: memref<1x128xf32, #tpu.memory_space<vmem>>, %arg4: memref<1x128xf32, #tpu.memory_space<vmem>>, %arg5: memref<64x128xf32, #tpu.memory_space<vmem>>) attributes {dimension_semantics = [#tpu.dimension_semantics<parallel>], iteration_bounds = array<i64: 2>, scalar_prefetch = 0 : i64, scratch_operands = 0 : i64, tpu.core_type = #tpu.core_type<tc>, window_params = [{transform_indices = @transform_0, window_bounds = array<i64: 1, 10, 10, 4>}, {pipeline_mode = #tpu.pipeline_mode<synchronous>, transform_indices = @transform_1, window_bounds = array<i64: 9, 4, 128>}, {pipeline_mode = #tpu.pipeline_mode<synchronous>, transform_indices = @transform_2, window_bounds = array<i64: 1, 128>}, {pipeline_mode = #tpu.pipeline_mode<synchronous>, transform_indices = @transform_3, window_bounds = array<i64: 1, 128>}, {transform_indices = @transform_4, window_bounds = array<i64: 64, 128>}]} {
    %c0 = arith.constant 0 : index
    %c0_0 = arith.constant 0 : index
    %c0_1 = arith.constant 0 : index
    %c0_2 = arith.constant 0 : index
    %0 = vector.load %arg1[%c0, %c0_0, %c0_1, %c0_2] : memref<1x10x10x4xbf16, #tpu.memory_space<vmem>>, vector<1x10x10x4xbf16>
    %1 = arith.extf %0 : vector<1x10x10x4xbf16> to vector<1x10x10x4xf32>
    %cst = arith.constant 0.000000e+00 : f32
    %2 = vector.broadcast %cst : f32 to vector<64x128xf32>
    %3 = vector.extract_strided_slice %1 {offsets = [0, 0, 0, 0], sizes = [1, 8, 8, 4], strides = [1, 1, 1, 1]} : vector<1x10x10x4xf32> to vector<1x8x8x4xf32>
    %4 = vector.shape_cast %3 : vector<1x8x8x4xf32> to vector<8x8x4xf32>
    %5 = vector.shape_cast %4 : vector<8x8x4xf32> to vector<64x4xf32>
    %6 = arith.truncf %5 : vector<64x4xf32> to vector<64x4xbf16>
    %c0_3 = arith.constant 0 : index
    %c0_4 = arith.constant 0 : index
    %c0_5 = arith.constant 0 : index
    %7 = vector.load %arg2[%c0_3, %c0_4, %c0_5] : memref<9x4x128xbf16, #tpu.memory_space<vmem>>, vector<1x4x128xbf16>
    %8 = vector.shape_cast %7 : vector<1x4x128xbf16> to vector<4x128xbf16>
    %cst_6 = arith.constant dense<0.000000e+00> : vector<64x128xf32>
    %9 = tpu.matmul %6, %8, %cst_6 {dimension_numbers = #tpu.dot_dimension_numbers<[1], [0], [0], [1], [0, 0, 1, 1], [], []>} : vector<64x4xbf16>, vector<4x128xbf16>, vector<64x128xf32> -> vector<64x128xf32>
    %10 = arith.addf %2, %9 : vector<64x128xf32>
    %11 = vector.extract_strided_slice %1 {offsets = [0, 0, 1, 0], sizes = [1, 8, 8, 4], strides = [1, 1, 1, 1]} : vector<1x10x10x4xf32> to vector<1x8x8x4xf32>
    %12 = vector.shape_cast %11 : vector<1x8x8x4xf32> to vector<8x8x4xf32>
    %13 = vector.shape_cast %12 : vector<8x8x4xf32> to vector<64x4xf32>
    %14 = arith.truncf %13 : vector<64x4xf32> to vector<64x4xbf16>
    %c1 = arith.constant 1 : index
    %c0_7 = arith.constant 0 : index
    %c0_8 = arith.constant 0 : index
    %15 = vector.load %arg2[%c1, %c0_7, %c0_8] : memref<9x4x128xbf16, #tpu.memory_space<vmem>>, vector<1x4x128xbf16>
    %16 = vector.shape_cast %15 : vector<1x4x128xbf16> to vector<4x128xbf16>
    %cst_9 = arith.constant dense<0.000000e+00> : vector<64x128xf32>
    %17 = tpu.matmul %14, %16, %cst_9 {dimension_numbers = #tpu.dot_dimension_numbers<[1], [0], [0], [1], [0, 0, 1, 1], [], []>} : vector<64x4xbf16>, vector<4x128xbf16>, vector<64x128xf32> -> vector<64x128xf32>
    %18 = arith.addf %10, %17 : vector<64x128xf32>
    %19 = vector.extract_strided_slice %1 {offsets = [0, 0, 2, 0], sizes = [1, 8, 8, 4], strides = [1, 1, 1, 1]} : vector<1x10x10x4xf32> to vector<1x8x8x4xf32>
    %20 = vector.shape_cast %19 : vector<1x8x8x4xf32> to vector<8x8x4xf32>
    %21 = vector.shape_cast %20 : vector<8x8x4xf32> to vector<64x4xf32>
    %22 = arith.truncf %21 : vector<64x4xf32> to vector<64x4xbf16>
    %c2 = arith.constant 2 : index
    %c0_10 = arith.constant 0 : index
    %c0_11 = arith.constant 0 : index
    %23 = vector.load %arg2[%c2, %c0_10, %c0_11] : memref<9x4x128xbf16, #tpu.memory_space<vmem>>, vector<1x4x128xbf16>
    %24 = vector.shape_cast %23 : vector<1x4x128xbf16> to vector<4x128xbf16>
    %cst_12 = arith.constant dense<0.000000e+00> : vector<64x128xf32>
    %25 = tpu.matmul %22, %24, %cst_12 {dimension_numbers = #tpu.dot_dimension_numbers<[1], [0], [0], [1], [0, 0, 1, 1], [], []>} : vector<64x4xbf16>, vector<4x128xbf16>, vector<64x128xf32> -> vector<64x128xf32>
    %26 = arith.addf %18, %25 : vector<64x128xf32>
    %27 = vector.extract_strided_slice %1 {offsets = [0, 1, 0, 0], sizes = [1, 8, 8, 4], strides = [1, 1, 1, 1]} : vector<1x10x10x4xf32> to vector<1x8x8x4xf32>
    %28 = vector.shape_cast %27 : vector<1x8x8x4xf32> to vector<8x8x4xf32>
    %29 = vector.shape_cast %28 : vector<8x8x4xf32> to vector<64x4xf32>
    %30 = arith.truncf %29 : vector<64x4xf32> to vector<64x4xbf16>
    %c3 = arith.constant 3 : index
    %c0_13 = arith.constant 0 : index
    %c0_14 = arith.constant 0 : index
    %31 = vector.load %arg2[%c3, %c0_13, %c0_14] : memref<9x4x128xbf16, #tpu.memory_space<vmem>>, vector<1x4x128xbf16>
    %32 = vector.shape_cast %31 : vector<1x4x128xbf16> to vector<4x128xbf16>
    %cst_15 = arith.constant dense<0.000000e+00> : vector<64x128xf32>
    %33 = tpu.matmul %30, %32, %cst_15 {dimension_numbers = #tpu.dot_dimension_numbers<[1], [0], [0], [1], [0, 0, 1, 1], [], []>} : vector<64x4xbf16>, vector<4x128xbf16>, vector<64x128xf32> -> vector<64x128xf32>
    %34 = arith.addf %26, %33 : vector<64x128xf32>
    %35 = vector.extract_strided_slice %1 {offsets = [0, 1, 1, 0], sizes = [1, 8, 8, 4], strides = [1, 1, 1, 1]} : vector<1x10x10x4xf32> to vector<1x8x8x4xf32>
    %36 = vector.shape_cast %35 : vector<1x8x8x4xf32> to vector<8x8x4xf32>
    %37 = vector.shape_cast %36 : vector<8x8x4xf32> to vector<64x4xf32>
    %38 = arith.truncf %37 : vector<64x4xf32> to vector<64x4xbf16>
    %c4 = arith.constant 4 : index
    %c0_16 = arith.constant 0 : index
    %c0_17 = arith.constant 0 : index
    %39 = vector.load %arg2[%c4, %c0_16, %c0_17] : memref<9x4x128xbf16, #tpu.memory_space<vmem>>, vector<1x4x128xbf16>
    %40 = vector.shape_cast %39 : vector<1x4x128xbf16> to vector<4x128xbf16>
    %cst_18 = arith.constant dense<0.000000e+00> : vector<64x128xf32>
    %41 = tpu.matmul %38, %40, %cst_18 {dimension_numbers = #tpu.dot_dimension_numbers<[1], [0], [0], [1], [0, 0, 1, 1], [], []>} : vector<64x4xbf16>, vector<4x128xbf16>, vector<64x128xf32> -> vector<64x128xf32>
    %42 = arith.addf %34, %41 : vector<64x128xf32>
    %43 = vector.extract_strided_slice %1 {offsets = [0, 1, 2, 0], sizes = [1, 8, 8, 4], strides = [1, 1, 1, 1]} : vector<1x10x10x4xf32> to vector<1x8x8x4xf32>
    %44 = vector.shape_cast %43 : vector<1x8x8x4xf32> to vector<8x8x4xf32>
    %45 = vector.shape_cast %44 : vector<8x8x4xf32> to vector<64x4xf32>
    %46 = arith.truncf %45 : vector<64x4xf32> to vector<64x4xbf16>
    %c5 = arith.constant 5 : index
    %c0_19 = arith.constant 0 : index
    %c0_20 = arith.constant 0 : index
    %47 = vector.load %arg2[%c5, %c0_19, %c0_20] : memref<9x4x128xbf16, #tpu.memory_space<vmem>>, vector<1x4x128xbf16>
    %48 = vector.shape_cast %47 : vector<1x4x128xbf16> to vector<4x128xbf16>
    %cst_21 = arith.constant dense<0.000000e+00> : vector<64x128xf32>
    %49 = tpu.matmul %46, %48, %cst_21 {dimension_numbers = #tpu.dot_dimension_numbers<[1], [0], [0], [1], [0, 0, 1, 1], [], []>} : vector<64x4xbf16>, vector<4x128xbf16>, vector<64x128xf32> -> vector<64x128xf32>
    %50 = arith.addf %42, %49 : vector<64x128xf32>
    %51 = vector.extract_strided_slice %1 {offsets = [0, 2, 0, 0], sizes = [1, 8, 8, 4], strides = [1, 1, 1, 1]} : vector<1x10x10x4xf32> to vector<1x8x8x4xf32>
    %52 = vector.shape_cast %51 : vector<1x8x8x4xf32> to vector<8x8x4xf32>
    %53 = vector.shape_cast %52 : vector<8x8x4xf32> to vector<64x4xf32>
    %54 = arith.truncf %53 : vector<64x4xf32> to vector<64x4xbf16>
    %c6 = arith.constant 6 : index
    %c0_22 = arith.constant 0 : index
    %c0_23 = arith.constant 0 : index
    %55 = vector.load %arg2[%c6, %c0_22, %c0_23] : memref<9x4x128xbf16, #tpu.memory_space<vmem>>, vector<1x4x128xbf16>
    %56 = vector.shape_cast %55 : vector<1x4x128xbf16> to vector<4x128xbf16>
    %cst_24 = arith.constant dense<0.000000e+00> : vector<64x128xf32>
    %57 = tpu.matmul %54, %56, %cst_24 {dimension_numbers = #tpu.dot_dimension_numbers<[1], [0], [0], [1], [0, 0, 1, 1], [], []>} : vector<64x4xbf16>, vector<4x128xbf16>, vector<64x128xf32> -> vector<64x128xf32>
    %58 = arith.addf %50, %57 : vector<64x128xf32>
    %59 = vector.extract_strided_slice %1 {offsets = [0, 2, 1, 0], sizes = [1, 8, 8, 4], strides = [1, 1, 1, 1]} : vector<1x10x10x4xf32> to vector<1x8x8x4xf32>
    %60 = vector.shape_cast %59 : vector<1x8x8x4xf32> to vector<8x8x4xf32>
    %61 = vector.shape_cast %60 : vector<8x8x4xf32> to vector<64x4xf32>
    %62 = arith.truncf %61 : vector<64x4xf32> to vector<64x4xbf16>
    %c7 = arith.constant 7 : index
    %c0_25 = arith.constant 0 : index
    %c0_26 = arith.constant 0 : index
    %63 = vector.load %arg2[%c7, %c0_25, %c0_26] : memref<9x4x128xbf16, #tpu.memory_space<vmem>>, vector<1x4x128xbf16>
    %64 = vector.shape_cast %63 : vector<1x4x128xbf16> to vector<4x128xbf16>
    %cst_27 = arith.constant dense<0.000000e+00> : vector<64x128xf32>
    %65 = tpu.matmul %62, %64, %cst_27 {dimension_numbers = #tpu.dot_dimension_numbers<[1], [0], [0], [1], [0, 0, 1, 1], [], []>} : vector<64x4xbf16>, vector<4x128xbf16>, vector<64x128xf32> -> vector<64x128xf32>
    %66 = arith.addf %58, %65 : vector<64x128xf32>
    %67 = vector.extract_strided_slice %1 {offsets = [0, 2, 2, 0], sizes = [1, 8, 8, 4], strides = [1, 1, 1, 1]} : vector<1x10x10x4xf32> to vector<1x8x8x4xf32>
    %68 = vector.shape_cast %67 : vector<1x8x8x4xf32> to vector<8x8x4xf32>
    %69 = vector.shape_cast %68 : vector<8x8x4xf32> to vector<64x4xf32>
    %70 = arith.truncf %69 : vector<64x4xf32> to vector<64x4xbf16>
    %c8 = arith.constant 8 : index
    %c0_28 = arith.constant 0 : index
    %c0_29 = arith.constant 0 : index
    %71 = vector.load %arg2[%c8, %c0_28, %c0_29] : memref<9x4x128xbf16, #tpu.memory_space<vmem>>, vector<1x4x128xbf16>
    %72 = vector.shape_cast %71 : vector<1x4x128xbf16> to vector<4x128xbf16>
    %cst_30 = arith.constant dense<0.000000e+00> : vector<64x128xf32>
    %73 = tpu.matmul %70, %72, %cst_30 {dimension_numbers = #tpu.dot_dimension_numbers<[1], [0], [0], [1], [0, 0, 1, 1], [], []>} : vector<64x4xbf16>, vector<4x128xbf16>, vector<64x128xf32> -> vector<64x128xf32>
    %74 = arith.addf %66, %73 : vector<64x128xf32>
    %c0_31 = arith.constant 0 : index
    %c0_32 = arith.constant 0 : index
    %75 = vector.load %arg3[%c0_31, %c0_32] : memref<1x128xf32, #tpu.memory_space<vmem>>, vector<1x128xf32>
    %76 = vector.broadcast %75 : vector<1x128xf32> to vector<64x128xf32>
    %77 = arith.mulf %74, %76 : vector<64x128xf32>
    %c0_33 = arith.constant 0 : index
    %c0_34 = arith.constant 0 : index
    %78 = vector.load %arg4[%c0_33, %c0_34] : memref<1x128xf32, #tpu.memory_space<vmem>>, vector<1x128xf32>
    %79 = vector.broadcast %78 : vector<1x128xf32> to vector<64x128xf32>
    %80 = arith.addf %77, %79 : vector<64x128xf32>
    %cst_35 = arith.constant 0.000000e+00 : f32
    %81 = vector.broadcast %cst_35 : f32 to vector<64x128xf32>
    %82 = arith.cmpf oge, %80, %81 : vector<64x128xf32>
    %cst_36 = arith.constant 0.00999999977 : f32
    %83 = vector.broadcast %cst_36 : f32 to vector<64x128xf32>
    %84 = arith.mulf %83, %80 : vector<64x128xf32>
    %85 = arith.select %82, %80, %84 : vector<64x128xi1>, vector<64x128xf32>
    %c0_37 = arith.constant 0 : index
    %c0_38 = arith.constant 0 : index
    %86 = vector.load %arg5[%c0_37, %c0_38] : memref<64x128xf32, #tpu.memory_space<vmem>>, vector<64x128xf32>
    tpu.vector_store %arg5[%c0_37, %c0_38], %85 {strides = array<i32>} : memref<64x128xf32, #tpu.memory_space<vmem>>, vector<64x128xf32>,
    return
  }
  func.func @transform_0(%arg0: i32) -> (i32, i32, i32, i32) {
    %c0_i32 = arith.constant 0 : i32
    %c0_i32_0 = arith.constant 0 : i32
    %c0_i32_1 = arith.constant 0 : i32
    %c0_i32_2 = arith.constant 0 : i32
    return %arg0, %c0_i32, %c0_i32_0, %c0_i32_1 : i32, i32, i32, i32
  }
  func.func @transform_1(%arg0: i32) -> (i32, i32, i32) {
    %c0_i32 = arith.constant 0 : i32
    %c0_i32_0 = arith.constant 0 : i32
    %c0_i32_1 = arith.constant 0 : i32
    %c0_i32_2 = arith.constant 0 : i32
    return %c0_i32, %c0_i32_0, %c0_i32_1 : i32, i32, i32
  }
  func.func @transform_2(%arg0: i32) -> (i32, i32) {
    %c0_i32 = arith.constant 0 : i32
    %c0_i32_0 = arith.constant 0 : i32
    %c0_i32_1 = arith.constant 0 : i32
    return %c0_i32, %c0_i32_0 : i32, i32
  }
  func.func @transform_3(%arg0: i32) -> (i32, i32) {
    %c0_i32 = arith.constant 0 : i32
    %c0_i32_0 = arith.constant 0 : i32
    %c0_i32_1 = arith.constant 0 : i32
    return %c0_i32, %c0_i32_0 : i32, i32
  }
  func.func @transform_4(%arg0: i32) -> (i32, i32) {
    %c0_i32 = arith.constant 0 : i32
    %c0_i32_0 = arith.constant 0 : i32
    return %arg0, %c0_i32 : i32, i32
  }
}

</mosaic_0001>

<bundles_post_ra>
// kernel: unet_down_forward.2
= control target key start
LH: loop header
LB: loop body
LE: loop exit
PB: predicated region body
PF: predicated region fallthrough
CT: control target
= control target key end

     0   :  { %s1484_s9 = smov 0   ;;  %s1732_s0 = inlined_call_operand.vmem [shape: bf16[2,10,10,4], index: 0, kind: input, shape index: {}]   ;;  %s1733_s1 = inlined_call_operand.vmem [shape: bf16[9,4,128], index: 1, kind: input, shape index: {}]   ;;  %s1734_s2 = inlined_call_operand.vmem [shape: f32[2,2,128], index: 2, kind: output, shape index: {}]  }
   0x1 LB: > { %s1170_s10 = sadd.s32 4294967295, %s1467_s9   ;;  %p1174_p0 = scmp.ge.s32.totalorder %s1467_s9, 1  ;;  %s1467_s9 = sphi %s1484_s9, %s12_s9  }
   0x2   : > { %p112_p1 = scmp.lt.s32.totalorder %s1467_s9, 3 }
   0x4   : > { %p113_p2 = pnand %p1174_p0, %p112_p1 }
   0x5   : > { %v1181_v0 = vld [vmem:[%s1733_s1 + $0x2] sm:$0x3] (!%p113_p2)  ;;  %vm256_vm0 = vcmask (!%p113_p2), 1041408   ;;  %v1498_v1 = vld [vmem:[%s1733_s1 + $0x8] sm:$0x3] (!%p113_p2)  ;;  %p133_p3 = scmp.lt.s32.totalorder (!%p113_p2), %s1170_s10, 1 }
   0x6   : > { %116 = sbr.rel (%p113_p2) target bundleno = 336 (0x150), region = 28  ;;  %1433 = vmatprep.subr.msk.bf16.mxu1 (!%p113_p2), %vm256_vm0, %v1181_v0  ;;  %1437 = vmatprep.subr.msk.bf16.mxu0 (!%p113_p2), %vm256_vm0, %v1498_v1  ;;  %v258_v2 = vsel (!%p113_p2), %vm256_vm0, %v1181_v0, 0  ;;  %v1506_v3 = vsel (!%p113_p2), %vm256_vm0, %v1498_v1, 0  ;;  %v187_v4 = vld [vmem:[%s1733_s1] sm:$0x3] (!%p113_p2)  ;;  %vm204_vm1 = vcmask (!%p113_p2), 1046528  }
   0x7   : > { %1278 = vmatpush3.bf16.msra.mxu1 (!%p113_p2), %v258_v2  ;;  %1318 = vmatpush3.bf16.msra.mxu0 (!%p113_p2), %v1506_v3  ;;  %v1209_v5 = vld [vmem:[%s1733_s1 + $0xa] sm:$0x3] (!%p113_p2)  ;;  %vm243_vm2 = vcmask (!%p113_p2), 31744   ;;  %v338_v27 = vsel (!%p113_p2), %vm256_vm0, %v187_v4, 0  ;;  %vm405_vm3 = vcmask (!%p113_p2), 1045504   ;;  %vm1114_vm4 = vcmask (!%p113_p2), 1040384  }
   0x8   : > { %1434 = vmatprep.subr.msk.bf16.mxu1 (!%p113_p2), %vm256_vm0, %v187_v4  ;;  %1439 = vmatprep.subr.msk.bf16.mxu0 (!%p113_p2), %vm256_vm0, %v1209_v5  ;;  %v749_v54 = vsel (!%p113_p2), %vm256_vm0, %v1209_v5, 0  ;;  %v1190_v60 = vld [vmem:[%s1733_s1 + $0x4] sm:$0x3] (!%p113_p2) }
   0xd   : > { %s1736_s10 = smov (!%p133_p3, %s1170_s10), 1 }
   0xe   : > { %s1443_s19 = smul.u32 80, %s1736_s10  ;;  %s1176_s5 = sshll.u32 %s1736_s10, 1 }
   0xf   : > { %s141_s8 = scalar_lea.vmem %s1734_s2, %s1176_s5 }
  0x10   : > { %s1523_s22 = scalar_lea.vmem %s1732_s0, %s1443_s19 }
  0x11   : > { %v1526_v6 = vld [vmem:[%s1523_s22] sm:$0xf]  ;;  %v1529_v7 = vld [vmem:[%s1523_s22 + $0x4] sm:$0x1]  ;;  %v1532_v8 = vld [vmem:[%s1523_s22 + $0x8] sm:$0xf] }
  0x12   : > { %v146_v9 = vld [vmem:[%s1523_s22 + $0xc] sm:$0x1]  ;;  %v163_v10 = vunpack.c.l.bf16 %v1526_v6  ;;  %v164_v11 = vunpack.c.l.bf16 %v1529_v7  ;;  %v165_v12 = vunpack.c.l.bf16 %v1532_v8  ;;  %v1539_v13 = vld [vmem:[%s1523_s22 + $0x10] sm:$0xf]  ;;  %v148_v14 = vld [vmem:[%s1523_s22 + $0x14] sm:$0x1] }
  0x13   : > { %v166_v15 = vunpack.c.l.bf16 %v146_v9  ;;  %v1543_v16 = vld [vmem:[%s1523_s22 + $0x18] sm:$0xf]  ;;  %v150_v17 = vld [vmem:[%s1523_s22 + $0x1c] sm:$0x1]  ;;  %v1547_v18 = vld [vmem:[%s1523_s22 + $0x20] sm:$0xf]  ;;  %v167_v19 = vunpack.c.l.bf16 %v1539_v13  ;;  %v168_v24 = vunpack.c.l.bf16 %v148_v14 }
  0x14   : > { %v205_v20 = vrot.slane %v163_v10, 1  ;;  %v206_v21 = vrot.slane %v164_v11, 1  ;;  %v208_v22 = vrot.slane %v165_v12, 1  ;;  %v152_v23 = vld [vmem:[%s1523_s22 + $0x24] sm:$0x1]  ;;  %v409_v26 = vrot.slane %v165_v12, 2 }
  0x15   : > { %v209_v25 = vrot.slane %v166_v15, 1  ;;  %v169_v29 = vunpack.c.l.bf16 %v1543_v16  ;;  %v170_v30 = vunpack.c.l.bf16 %v150_v17  ;;  %v171_v31 = vunpack.c.l.bf16 %v1547_v18  ;;  %v1561_v40 = vld [vmem:[%s1523_s22 + $0x28] sm:$0xf]  ;;  %v154_v43 = vld [vmem:[%s1523_s22 + $0x2c] sm:$0x1] }
  0x16   : > { %v207_v28 = vsel %vm204_vm1, %v205_v20, %v206_v21  ;;  %v410_v33 = vrot.slane %v166_v15, 2  ;;  %v172_v34 = vunpack.c.l.bf16 %v152_v23  ;;  %v211_v35 = vrot.slane %v167_v19, 1  ;;  %v1565_v44 = vld [vmem:[%s1523_s22 + $0x30] sm:$0xf]  ;;  %v156_v49 = vld [vmem:[%s1523_s22 + $0x34] sm:$0x1] }
  0x17   : > { %v210_v32 = vsel %vm204_vm1, %v208_v22, %v209_v25  ;;  %v212_v37 = vrot.slane %v168_v24, 1  ;;  %v214_v38 = vrot.slane %v169_v29, 1  ;;  %v215_v39 = vrot.slane %v170_v30, 1  ;;  %v1572_v50 = vld [vmem:[%s1523_s22 + $0x38] sm:$0xf] }
  0x18   : > { %v237_v36 = vpack.c.bf16 %v210_v32, %v207_v28  ;;  %v217_v41 = vrot.slane %v171_v31, 1  ;;  %v218_v42 = vrot.slane %v172_v34, 1  ;;  %v412_v47 = vrot.slane %v167_v19, 2  ;;  %v158_v55 = vld [vmem:[%s1523_s22 + $0x3c] sm:$0x1] }
  0x19   : > { %v213_v45 = vsel %vm204_vm1, %v211_v35, %v212_v37  ;;  %v216_v46 = vsel %vm204_vm1, %v214_v38, %v215_v39  ;;  %v413_v48 = vrot.slane %v168_v24, 2  ;;  %v415_v53 = vrot.slane %v169_v29, 2  ;;  %v1215_v12 = vld [vmem:[%s1733_s1 + $0xc] sm:$0x3]  ;;  %v1614_v28 = vld [vmem:[%s1523_s22 + $0x44] sm:$0x1] }
  0x1a   : > { %1279 = vmatprep.mubr.msk.bf16.mxu1 %vm243_vm2, %v237_v36  ;;  %v219_v51 = vsel %vm204_vm1, %v217_v41, %v218_v42  ;;  %v1575_v52 = vpack.c.bf16 %v216_v46, %v213_v45  ;;  %v416_v56 = vrot.slane %v170_v30, 2  ;;  %v632_v57 = vpack.c.bf16 %v213_v45, %v210_v32 }
  0x1b   : > { %v633_v58 = vpack.c.bf16 %v219_v51, %v216_v46  ;;  %v173_v59 = vunpack.c.l.bf16 %v1561_v40  ;;  %v174_v61 = vunpack.c.l.bf16 %v154_v43  ;;  %v175_v62 = vunpack.c.l.bf16 %v1565_v44 }
  0x1c   : > { %1280 = vmatmul.mubr.msk.bf16.vlgmr.msra.gmra.mrb[0].mxu1 %vm243_vm2, %v1575_v52  ;;  %v176_v63 = vunpack.c.l.bf16 %v156_v49  ;;  %v177_v0 = vunpack.c.l.bf16 %v1572_v50  ;;  %1319 = vmatprep.mubr.msk.bf16.mxu0 %vm243_vm2, %v632_v57  ;;  %v178_v4 = vunpack.c.l.bf16 %v158_v55  ;;  %v1589_v5 = vsel %vm405_vm3, %v409_v26, %v410_v33  ;;  %v1220_v55 = vld [vmem:[%s1733_s1 + $0xe] sm:$0x3] }
  0x1d   : > { %1288 = vmatpush3.bf16.msra.mxu1 %v338_v27  ;;  %v220_v2 = vrot.slane %v173_v59, 1  ;;  %v1592_v9 = vsel %vm405_vm3, %v412_v47, %v413_v48  ;;  %1320 = vmatmul.mubr.msk.bf16.vlgmr.msra.gmra.mrb[0].mxu0 %vm243_vm2, %v633_v58  ;;  %v221_v14 = vrot.slane %v174_v61, 1  ;;  %v223_v15 = vrot.slane %v175_v62, 1  ;;  %v1611_v27 = vld [vmem:[%s1523_s22 + $0x40] sm:$0xf] }
  0x1e   : > { %v224_v17 = vrot.slane %v176_v63, 1  ;;  %v226_v19 = vrot.slane %v177_v0, 1  ;;  %1435 = vmatprep.subr.msk.bf16.mxu1 %vm256_vm0, %v1190_v60  ;;  %v418_v20 = vrot.slane %v171_v31, 2  ;;  %v419_v21 = vrot.slane %v172_v34, 2  ;;  %1328 = vmatpush3.bf16.msra.mxu0 %v749_v54 }
  0x1f   : > { %v227_v22 = vrot.slane %v178_v4, 1  ;;  %v730_v23 = vpack.c.bf16 %v1592_v9, %v1589_v5  ;;  %v1602_v24 = vsel %vm204_vm1, %v220_v2, %v221_v14  ;;  %1440 = vmatprep.subr.msk.bf16.mxu0 %vm256_vm0, %v1215_v12  ;;  %v1177_v26 = vcombine.low %v1526_v6, %v1532_v8  ;;  %v1199_v6 = vld [vmem:[%s1733_s1 + $0x6] sm:$0x3]  ;;  %v1225_v2 = vld [vmem:[%s1733_s1 + $0x10] sm:$0x3] }
  0x20   : > { %v1605_v25 = vsel %vm204_vm1, %v223_v15, %v224_v17  ;;  %v1617_v29 = vpack.c.bf16 %v1602_v24, %v219_v51  ;;  %v421_v31 = vrot.slane %v173_v59, 2  ;;  %v422_v32 = vrot.slane %v174_v61, 2  ;;  %v162_v14 = vld [vmem:[%s1523_s22 + $0x4c] sm:$0x1] }
  0x21   : > { %v1620_v30 = vsel %vm204_vm1, %v226_v19, %v227_v22  ;;  %1329 = vmatprep.mubr.msk.bf16.mxu0 %vm243_vm2, %v730_v23  ;;  %v424_v34 = vrot.slane %v175_v62, 2  ;;  %v425_v35 = vrot.slane %v176_v63, 2  ;;  %v417_v36 = vsel %vm405_vm3, %v415_v53, %v416_v56 }
  0x22   : > { %v1625_v33 = vpack.c.bf16 %v1620_v30, %v1605_v25  ;;  %1283 = vmatprep.mubr.msk.bf16.mxu1 %vm243_vm2, %v1617_v29  ;;  %v420_v37 = vsel %vm405_vm3, %v418_v20, %v419_v21  ;;  %v179_v38 = vunpack.c.l.bf16 %v1611_v27  ;;  %v180_v39 = vunpack.c.l.bf16 %v1614_v28 }
  0x23   : > { %v423_v41 = vsel %vm405_vm3, %v421_v31, %v422_v32  ;;  %v426_v42 = vsel %vm405_vm3, %v424_v34, %v425_v35  ;;  %v731_v43 = vpack.c.bf16 %v420_v37, %v417_v36  ;;  %v427_v45 = vrot.slane %v177_v0, 2 }
  0x24   : > { %1284 = vmatmul.mubr.msk.bf16.gmra.mrb[4].mxu1 %vm243_vm2, %v1625_v33  ;;  %v732_v46 = vpack.c.bf16 %v426_v42, %v423_v41  ;;  %v428_v47 = vrot.slane %v178_v4, 2  ;;  %v726_v48 = vrot.slane %v179_v38, 2  ;;  %v727_v49 = vrot.slane %v180_v39, 2 }
  0x25   : > { %1289 = vmatprep.mubr.msk.bf16.mxu1 %vm243_vm2, %v1177_v26  ;;  %v1178_v51 = vcombine.low %v1539_v13, %v1543_v16  ;;  %v831_v53 = vsel %vm256_vm0, %v1215_v12, 0  ;;  %v1179_v54 = vcombine.low %v1547_v18, %v1561_v40  ;;  %v406_v56 = vrot.slane %v163_v10, 2 }
  0x26   : > { %v407_v57 = vrot.slane %v164_v11, 2  ;;  %v457_v58 = vsel %vm256_vm0, %v1190_v60, 0  ;;  %v429_v59 = vsel %vm405_vm3, %v427_v45, %v428_v47  ;;  %v1655_v61 = vsel %vm405_vm3, %v726_v48, %v727_v49 }
  0x27   : > { %v733_v7 = vpack.c.bf16 %v1655_v61, %v429_v59  ;;  %v1180_v11 = vcombine.low %v1565_v44, %v1572_v50  ;;  %v439_v62 = vpack.c.bf16 %v417_v36, %v1592_v9  ;;  %v919_v63 = vsel %vm256_vm0, %v1220_v55, 0 }
  0x28   : > { %v408_v10 = vsel %vm405_vm3, %v406_v56, %v407_v57  ;;  %v440_v0 = vpack.c.bf16 %v423_v41, %v420_v37  ;;  %v551_v4 = vsel %vm256_vm0, %v1199_v6, 0  ;;  %v441_v12 = vpack.c.bf16 %v429_v59, %v426_v42 }
  0x29   : > { %1330 = vmatmul.mubr.msk.bf16.vlgmr.msra.gmra.mrb[0].mxu0 %vm243_vm2, %v731_v43  ;;  %v438_v60 = vpack.c.bf16 %v1589_v5, %v408_v10  ;;  %v161_v5 = vld [vmem:[%s1523_s22 + $0x48] sm:$0xf]  ;;  %v1195_v15 = vcombine.low %v1532_v8, %v1539_v13  ;;  %v182_v19 = vunpack.c.l.bf16 %v162_v14  ;;  %v628_v21 = vrot.slane %v179_v38, 1 }
  0x2a   : > { %1338 = vmatpush3.bf16.msra.mxu0 %v831_v53  ;;  %1333 = vmatprep.mubr.msk.bf16.mxu0 %vm243_vm2, %v732_v46  ;;  %v1214_v9 = vcombine.low %v1611_v27, %v161_v5  ;;  %v181_v17 = vunpack.c.l.bf16 %v161_v5  ;;  %v629_v22 = vrot.slane %v180_v39, 1  ;;  %v1196_v23 = vcombine.low %v1543_v16, %v1547_v18 }
  0x2b   : > { %1441 = vmatprep.subr.msk.bf16.mxu0 %vm256_vm0, %v1220_v55  ;;  %v1005_v8 = vsel %vm256_vm0, %v1225_v2, 0  ;;  %v1197_v13 = vcombine.low %v1561_v40, %v1565_v44  ;;  %v1198_v18 = vcombine.low %v1572_v50, %v1611_v27  ;;  %v634_v40 = vpack.c.bf16 %v1605_v25, %v1602_v24 }
  0x2c   : > { %1290 = vmatmul.mubr.msk.bf16.vlgmr.msra.gmra.mrb[0].mxu1 %vm243_vm2, %v1178_v51  ;;  %v908_v20 = vrot.slane %v181_v17, 1  ;;  %v994_v44 = vrot.slane %v181_v17, 2  ;;  %v995_v28 = vrot.slane %v182_v19, 2 }
  0x2d   : > { %1298 = vmatpush3.bf16.msra.mxu1 %v457_v58  ;;  %1293 = vmatprep.mubr.msk.bf16.mxu1 %vm243_vm2, %v1179_v54 }
  0x2e   : > { %1436 = vmatprep.subr.msk.bf16.mxu1 %vm256_vm0, %v1199_v6 }
  0x31   : > { %1334 = vmatmul.mubr.msk.bf16.gmra.mrb[4].mxu0 %vm243_vm2, %v733_v7 }
  0x32   : > { %1339 = vmatprep.mubr.msk.bf16.mxu0 %vm243_vm2, %v1178_v51 }
  0x34   : > { %1294 = vmatmul.mubr.msk.bf16.gmra.mrb[4].mxu1 %vm243_vm2, %v1180_v11 }
  0x35   : > { %1299 = vmatprep.mubr.msk.bf16.mxu1 %vm243_vm2, %v438_v60 }
  0x39   : > { %1340 = vmatmul.mubr.msk.bf16.vlgmr.msra.gmra.mrb[0].mxu0 %vm243_vm2, %v1179_v54 }
  0x3a   : > { %1348 = vmatpush3.bf16.msra.mxu0 %v919_v63  ;;  %1343 = vmatprep.mubr.msk.bf16.mxu0 %vm243_vm2, %v1180_v11 }
  0x3b   : > { %1442 = vmatprep.subr.msk.bf16.mxu0 %vm256_vm0, %v1225_v2 }
  0x3c   : > { %1300 = vmatmul.mubr.msk.bf16.vlgmr.msra.gmra.mrb[0].mxu1 %vm243_vm2, %v439_v62 }
  0x3d   : > { %1308 = vmatpush3.bf16.msra.mxu1 %v551_v4  ;;  %1303 = vmatprep.mubr.msk.bf16.mxu1 %vm243_vm2, %v440_v0 }
  0x3e   : > { %1438 = vmatprep.subr.msk.bf16.mxu1 %vm256_vm0, %v1498_v1  ;;  %v909_v1 = vrot.slane %v182_v19, 1 }
  0x40   : > { %v910_v26 = vsel %vm204_vm1, %v908_v20, %v909_v1 }
  0x41   : > { %1344 = vmatmul.mubr.msk.bf16.gmra.mrb[4].mxu0 %vm243_vm2, %v1214_v9 }
  0x42   : > { %1349 = vmatprep.mubr.msk.bf16.mxu0 %vm243_vm2, %v1575_v52  ;;  %v630_v52 = vsel %vm204_vm1, %v628_v21, %v629_v22 }
  0x43   : > { %v912_v16 = vpack.c.bf16 %v910_v26, %v630_v52  ;;  %v635_v50 = vpack.c.bf16 %v630_v52, %v1620_v30 }
  0x44   : > { %1304 = vmatmul.mubr.msk.bf16.gmra.mrb[4].mxu1 %vm243_vm2, %v441_v12 }
  0x45   : > { %1309 = vmatprep.mubr.msk.bf16.mxu1 %vm243_vm2, %v1195_v15 }
  0x49   : > { %1350 = vmatmul.mubr.msk.bf16.vlgmr.msra.gmra.mrb[0].mxu0 %vm243_vm2, %v1617_v29 }
  0x4a   : > { %1358 = vmatpush3.bf16.msra.mxu0 %v1005_v8  ;;  %1353 = vmatprep.mubr.msk.bf16.mxu0 %vm243_vm2, %v1625_v33 }
  0x4c   : > { %1310 = vmatmul.mubr.msk.bf16.vlgmr.msra.gmra.mrb[0].mxu1 %vm243_vm2, %v1196_v23 }
  0x4d   : > { %1368 = vmatpush3.bf16.msra.mxu1 %v1506_v3  ;;  %1313 = vmatprep.mubr.msk.bf16.mxu1 %vm243_vm2, %v1197_v13  ;;  %v996_v3 = vsel %vm405_vm3, %v994_v44, %v995_v28 }
  0x4e   : > { %v998_v24 = vpack.c.bf16 %v996_v3, %v1655_v61 }
  0x51   : > { %1354 = vmatmul.mubr.msk.bf16.gmra.mrb[4].mxu0 %vm243_vm2, %v912_v16 }
  0x52   : > { %1359 = vmatprep.mubr.msk.bf16.mxu0 %vm243_vm2, %v439_v62 }
  0x54   : > { %1314 = vmatmul.mubr.msk.bf16.gmra.mrb[4].mxu1 %vm243_vm2, %v1198_v18 }
  0x55   : > { %1323 = vmatprep.mubr.msk.bf16.mxu1 %vm243_vm2, %v634_v40 }
  0x59   : > { %1360 = vmatmul.mubr.msk.bf16.vlgmr.msra.gmra.mrb[0].mxu0 %vm243_vm2, %v440_v0 }
  0x5a   : > { %1363 = vmatprep.mubr.msk.bf16.mxu0 %vm243_vm2, %v441_v12 }
  0x60   : > { %1324 = vmatmul.mubr.msk.bf16.vlgmr.msra.gmra.mrb[4].mxu1 %vm243_vm2, %v635_v50 }
  0x61   : > { %1364 = vmatmul.mubr.msk.bf16.gmra.mrb[4].mxu0 %vm243_vm2, %v998_v24 }
 0x11f   : > { %v1311_v25 = vpop.f32.mrb[0].mxu1 }
 0x120   : > { %v587_v27 = vpop.f32.mrb[1].mxu1 }
 0x121   : > { %v1312_v29 = vpop.f32.mrb[2].mxu1 }
 0x122   : > { %v590_v31 = vpop.f32.mrb[3].mxu1 }
 0x12c   : > { %v1361_v32 = vpop.f32.mrb[0].mxu0 }
 0x12d   : > { %v1369_v33 = vadd.f32 %v1361_v32, %v1311_v25  ;;  %v1041_v34 = vpop.f32.mrb[1].mxu0 }
 0x12e   : > { %v1370_v35 = vadd.f32 %v1041_v34, %v587_v27  ;;  %v1362_v36 = vpop.f32.mrb[2].mxu0 }
 0x12f   : > { %v1371_v37 = vadd.f32 %v1362_v36, %v1312_v29  ;;  %v1044_v38 = vpop.f32.mrb[3].mxu0  ;;  %v1095_v46 = vmul.f32 %v1369_v33, %v1369_v33 }
 0x130   : > { %v1372_v39 = vadd.f32 %v1044_v38, %v590_v31  ;;  %v1093_v41 = vmul.f32 %v1370_v35, %v1370_v35 }
 0x131   : > { %v1096_v56 = vmul.f32 %v1371_v37, %v1371_v37 }
 0x132   : > { %v1080_v30 = vadd.f32 %v1372_v39, %v1370_v35  ;;  %v1094_v42 = vmul.f32 %v1372_v39, %v1372_v39 }
 0x133   : > { %v1325_v43 = vpop.f32.mrb[4].mxu1 }
 0x134   : > { %v703_v45 = vpop.f32.mrb[5].mxu1  ;;  %v1081_v47 = vadd.f32 %v1369_v33, %v1080_v30  ;;  %v1101_v48 = vadd.f32 %v1094_v42, %v1093_v41  ;;  %v1365_v49 = vpop.f32.mrb[4].mxu0 }
 0x135   : > { %v1326_v51 = vpop.f32.mrb[6].mxu1  ;;  %v1373_v53 = vadd.f32 %v1365_v49, %v1325_v43  ;;  %v1057_v54 = vpop.f32.mrb[5].mxu0 }
 0x136   : > { %v706_v55 = vpop.f32.mrb[7].mxu1  ;;  %v1102_v57 = vadd.f32 %v1101_v48, %v1095_v46  ;;  %v1374_v58 = vadd.f32 %v1057_v54, %v703_v45  ;;  %v1082_v59 = vadd.f32 %v1371_v37, %v1081_v47  ;;  %v1366_v61 = vpop.f32.mrb[6].mxu0 }
 0x137   : > { %v1375_v6 = vadd.f32 %v1366_v61, %v1326_v51  ;;  %v1060_v7 = vpop.f32.mrb[7].mxu0  ;;  %v1099_v4 = vmul.f32 %v1373_v53, %v1373_v53 }
 0x138   : > { %v1083_v10 = vadd.f32 %v1374_v58, %v1082_v59  ;;  %v1097_v11 = vmul.f32 %v1374_v58, %v1374_v58  ;;  %v1103_v60 = vadd.f32 %v1102_v57, %v1096_v56  ;;  %v1376_v62 = vadd.f32 %v1060_v7, %v706_v55 }
 0x139   : > { %v1100_v12 = vmul.f32 %v1375_v6, %v1375_v6 }
 0x13a   : > { %v1104_v63 = vadd.f32 %v1103_v60, %v1097_v11  ;;  %v1084_v0 = vadd.f32 %v1376_v62, %v1083_v10  ;;  %v1098_v2 = vmul.f32 %v1376_v62, %v1376_v62 }
 0x13c   : > { %v1085_v5 = vadd.f32 %v1373_v53, %v1084_v0  ;;  %v1105_v9 = vadd.f32 %v1104_v63, %v1098_v2 }
 0x13e   : > { %v1086_v14 = vadd.f32 %v1375_v6, %v1085_v5  ;;  %v1106_v15 = vadd.f32 %v1105_v9, %v1099_v4 }
 0x140   : > { %v1087_v17 = vrot.slane %v1086_v14, 4  ;;  %v1107_v19 = vadd.f32 %v1106_v15, %v1100_v12 }
 0x142   : > { %v1088_v20 = vadd.f32 %v1087_v17, %v1086_v14  ;;  %v1108_v21 = vrot.slane %v1107_v19, 4 }
 0x144   : > { %v1089_v22 = vrot.slane %v1088_v20, 2  ;;  %v1109_v1 = vadd.f32 %v1108_v21, %v1107_v19 }
 0x146   : > { %v1090_v23 = vadd.f32 %v1089_v22, %v1088_v20  ;;  %v1110_v8 = vrot.slane %v1109_v1, 2 }
 0x148   : > { %v1091_v13 = vrot.slane %v1090_v23, 1  ;;  %v1111_v52 = vadd.f32 %v1110_v8, %v1109_v1 }
 0x14a   : > { %v1112_v26 = vrot.slane %v1111_v52, 1  ;;  %v1092_v16 = vadd.f32 %v1091_v13, %v1090_v23 }
 0x14c   : > { %v1113_v18 = vadd.f32 %v1112_v26, %v1111_v52 }
 0x14e   : > { %v1115_v40 = vsel %vm1114_vm4, %v1092_v16, %v1113_v18 }
 0x14f   : > { %1116 = vst [vmem:[%s141_s8] sm:$0x3] %v1115_v40 }
 0x150 PF: > { %s12_s9 = sadd.s32 1, %s1467_s9  }
 0x151   : > { %p9_p4 = scmp.ge.s32.totalorder %s12_s9, 4  }
 0x153   :  { %11 = sbr.rel (!%p9_p4) target bundleno = 1 (0x1), region = 66 }

// kernel: unet_down_forward.3
= control target key start
LH: loop header
LB: loop body
LE: loop exit
PB: predicated region body
PF: predicated region fallthrough
CT: control target
= control target key end

     0   :  { %s1582_s15 = smov 0   ;;  %s1847_s0 = inlined_call_operand.vmem [shape: bf16[2,10,10,4], index: 0, kind: input, shape index: {}]   ;;  %s1848_s1 = inlined_call_operand.vmem [shape: bf16[9,4,128], index: 1, kind: input, shape index: {}]   ;;  %s1849_s2 = inlined_call_operand.vmem [shape: f32[1,128], index: 2, kind: input, shape index: {}]   ;;  %s1850_s3 = inlined_call_operand.vmem [shape: f32[1,128], index: 3, kind: input, shape index: {}]   ;;  %s1851_s4 = inlined_call_operand.vmem [shape: f32[128,128], index: 4, kind: output, shape index: {}]  }
   0x1 LB: > { %s1588_s16 = sadd.s32 4294967295, %s1555_s15   ;;  %p1259_p0 = scmp.ge.s32.totalorder %s1555_s15, 1  ;;  %s1555_s15 = sphi %s1582_s15, %s14_s15  }
   0x2   : > { %p162_p1 = scmp.lt.s32.totalorder %s1555_s15, 3 }
   0x4   : > { %p163_p2 = pnand %p1259_p0, %p162_p1 }
   0x5   : > { %v1267_v0 = vld [vmem:[%s1848_s1 + $0x2] sm:$0x3] (!%p163_p2)  ;;  %vm313_vm0 = vcmask (!%p163_p2), 1041408   ;;  %v1598_v1 = vld [vmem:[%s1848_s1 + $0x8] sm:$0x3] (!%p163_p2)  ;;  %p188_p3 = scmp.lt.s32.totalorder (!%p163_p2), %s1588_s16, 1 }
   0x6   : > { %166 = sbr.rel (%p163_p2) target bundleno = 323 (0x143), region = 36  ;;  %1521 = vmatprep.subr.msk.bf16.mxu1 (!%p163_p2), %vm313_vm0, %v1267_v0  ;;  %1525 = vmatprep.subr.msk.bf16.mxu0 (!%p163_p2), %vm313_vm0, %v1598_v1  ;;  %v315_v2 = vsel (!%p163_p2), %vm313_vm0, %v1267_v0, 0  ;;  %v1607_v3 = vsel (!%p163_p2), %vm313_vm0, %v1598_v1, 0  ;;  %v244_v4 = vld [vmem:[%s1848_s1] sm:$0x3] (!%p163_p2)  ;;  %vm261_vm1 = vcmask (!%p163_p2), 1046528  }
   0x7   : > { %1366 = vmatpush3.bf16.msra.mxu1 (!%p163_p2), %v315_v2  ;;  %1406 = vmatpush3.bf16.msra.mxu0 (!%p163_p2), %v1607_v3  ;;  %v1295_v5 = vld [vmem:[%s1848_s1 + $0xa] sm:$0x3] (!%p163_p2)  ;;  %vm300_vm2 = vcmask (!%p163_p2), 31744   ;;  %v395_v27 = vsel (!%p163_p2), %vm313_vm0, %v244_v4, 0  ;;  %vm462_vm3 = vcmask (!%p163_p2), 1045504   ;;  %s1261_s14 = sshll.u32 (!%p163_p2), %s1588_s16, 3 }
   0x8   : > { %1522 = vmatprep.subr.msk.bf16.mxu1 (!%p163_p2), %vm313_vm0, %v244_v4  ;;  %1527 = vmatprep.subr.msk.bf16.mxu0 (!%p163_p2), %vm313_vm0, %v1295_v5  ;;  %v806_v54 = vsel (!%p163_p2), %vm313_vm0, %v1295_v5, 0  ;;  %v1276_v60 = vld [vmem:[%s1848_s1 + $0x4] sm:$0x3] (!%p163_p2)  ;;  %p194_p4 = scmp.lt.s32.totalorder (!%p163_p2), %s1261_s14, 15 }
   0xd   : > { %s189_s23 = scalar_select %p188_p3, %s1588_s16, 1 }
   0xe   : > { %s1853_s14 = smov (!%p194_p4, %s1261_s14), 15 }
   0xf   : > { %s1531_s26 = smul.u32 80, %s189_s23  ;;  %s1262_s21 = sshll.u32 %s1853_s14, 3 }
  0x10   : > { %s1834_s23 = scalar_lea.vmem %s1851_s4, %s1262_s21 }
  0x11   : > { %s1622_s29 = scalar_lea.vmem %s1847_s0, %s1531_s26 }
  0x12   : > { %v1625_v6 = vld [vmem:[%s1622_s29] sm:$0xf]  ;;  %v1628_v7 = vld [vmem:[%s1622_s29 + $0x4] sm:$0x1]  ;;  %v1631_v8 = vld [vmem:[%s1622_s29 + $0x8] sm:$0xf] }
  0x13   : > { %v203_v9 = vld [vmem:[%s1622_s29 + $0xc] sm:$0x1]  ;;  %v220_v10 = vunpack.c.l.bf16 %v1625_v6  ;;  %v221_v11 = vunpack.c.l.bf16 %v1628_v7  ;;  %v222_v12 = vunpack.c.l.bf16 %v1631_v8  ;;  %v1638_v13 = vld [vmem:[%s1622_s29 + $0x10] sm:$0xf]  ;;  %v205_v14 = vld [vmem:[%s1622_s29 + $0x14] sm:$0x1] }
  0x14   : > { %v223_v15 = vunpack.c.l.bf16 %v203_v9  ;;  %v1642_v16 = vld [vmem:[%s1622_s29 + $0x18] sm:$0xf]  ;;  %v207_v17 = vld [vmem:[%s1622_s29 + $0x1c] sm:$0x1]  ;;  %v1646_v18 = vld [vmem:[%s1622_s29 + $0x20] sm:$0xf]  ;;  %v224_v19 = vunpack.c.l.bf16 %v1638_v13  ;;  %v225_v24 = vunpack.c.l.bf16 %v205_v14 }
  0x15   : > { %v262_v20 = vrot.slane %v220_v10, 1  ;;  %v263_v21 = vrot.slane %v221_v11, 1  ;;  %v265_v22 = vrot.slane %v222_v12, 1  ;;  %v209_v23 = vld [vmem:[%s1622_s29 + $0x24] sm:$0x1]  ;;  %v466_v26 = vrot.slane %v222_v12, 2 }
  0x16   : > { %v266_v25 = vrot.slane %v223_v15, 1  ;;  %v226_v29 = vunpack.c.l.bf16 %v1642_v16  ;;  %v227_v30 = vunpack.c.l.bf16 %v207_v17  ;;  %v228_v31 = vunpack.c.l.bf16 %v1646_v18  ;;  %v1660_v40 = vld [vmem:[%s1622_s29 + $0x28] sm:$0xf]  ;;  %v211_v43 = vld [vmem:[%s1622_s29 + $0x2c] sm:$0x1] }
  0x17   : > { %v264_v28 = vsel %vm261_vm1, %v262_v20, %v263_v21  ;;  %v467_v33 = vrot.slane %v223_v15, 2  ;;  %v229_v34 = vunpack.c.l.bf16 %v209_v23  ;;  %v268_v35 = vrot.slane %v224_v19, 1  ;;  %v1664_v44 = vld [vmem:[%s1622_s29 + $0x30] sm:$0xf]  ;;  %v213_v49 = vld [vmem:[%s1622_s29 + $0x34] sm:$0x1] }
  0x18   : > { %v267_v32 = vsel %vm261_vm1, %v265_v22, %v266_v25  ;;  %v269_v37 = vrot.slane %v225_v24, 1  ;;  %v271_v38 = vrot.slane %v226_v29, 1  ;;  %v272_v39 = vrot.slane %v227_v30, 1  ;;  %v1671_v50 = vld [vmem:[%s1622_s29 + $0x38] sm:$0xf] }
  0x19   : > { %v294_v36 = vpack.c.bf16 %v267_v32, %v264_v28  ;;  %v274_v41 = vrot.slane %v228_v31, 1  ;;  %v275_v42 = vrot.slane %v229_v34, 1  ;;  %v469_v47 = vrot.slane %v224_v19, 2  ;;  %v215_v55 = vld [vmem:[%s1622_s29 + $0x3c] sm:$0x1] }
  0x1a   : > { %v270_v45 = vsel %vm261_vm1, %v268_v35, %v269_v37  ;;  %v273_v46 = vsel %vm261_vm1, %v271_v38, %v272_v39  ;;  %v470_v48 = vrot.slane %v225_v24, 2  ;;  %v472_v53 = vrot.slane %v226_v29, 2  ;;  %v1301_v12 = vld [vmem:[%s1848_s1 + $0xc] sm:$0x3]  ;;  %v1713_v28 = vld [vmem:[%s1622_s29 + $0x44] sm:$0x1] }
  0x1b   : > { %1367 = vmatprep.mubr.msk.bf16.mxu1 %vm300_vm2, %v294_v36  ;;  %v276_v51 = vsel %vm261_vm1, %v274_v41, %v275_v42  ;;  %v1674_v52 = vpack.c.bf16 %v273_v46, %v270_v45  ;;  %v473_v56 = vrot.slane %v227_v30, 2  ;;  %v689_v57 = vpack.c.bf16 %v270_v45, %v267_v32 }
  0x1c   : > { %v690_v58 = vpack.c.bf16 %v276_v51, %v273_v46  ;;  %v230_v59 = vunpack.c.l.bf16 %v1660_v40  ;;  %v231_v61 = vunpack.c.l.bf16 %v211_v43  ;;  %v232_v62 = vunpack.c.l.bf16 %v1664_v44 }
  0x1d   : > { %1368 = vmatmul.mubr.msk.bf16.vlgmr.msra.gmra.mrb[0].mxu1 %vm300_vm2, %v1674_v52  ;;  %v233_v63 = vunpack.c.l.bf16 %v213_v49  ;;  %v234_v0 = vunpack.c.l.bf16 %v1671_v50  ;;  %1407 = vmatprep.mubr.msk.bf16.mxu0 %vm300_vm2, %v689_v57  ;;  %v235_v4 = vunpack.c.l.bf16 %v215_v55  ;;  %v1688_v5 = vsel %vm462_vm3, %v466_v26, %v467_v33  ;;  %v1306_v55 = vld [vmem:[%s1848_s1 + $0xe] sm:$0x3] }
  0x1e   : > { %1376 = vmatpush3.bf16.msra.mxu1 %v395_v27  ;;  %v277_v2 = vrot.slane %v230_v59, 1  ;;  %v1691_v9 = vsel %vm462_vm3, %v469_v47, %v470_v48  ;;  %1408 = vmatmul.mubr.msk.bf16.vlgmr.msra.gmra.mrb[0].mxu0 %vm300_vm2, %v690_v58  ;;  %v278_v14 = vrot.slane %v231_v61, 1  ;;  %v280_v15 = vrot.slane %v232_v62, 1  ;;  %v1710_v27 = vld [vmem:[%s1622_s29 + $0x40] sm:$0xf] }
  0x1f   : > { %v281_v17 = vrot.slane %v233_v63, 1  ;;  %v283_v19 = vrot.slane %v234_v0, 1  ;;  %1523 = vmatprep.subr.msk.bf16.mxu1 %vm313_vm0, %v1276_v60  ;;  %v475_v20 = vrot.slane %v228_v31, 2  ;;  %v476_v21 = vrot.slane %v229_v34, 2  ;;  %1416 = vmatpush3.bf16.msra.mxu0 %v806_v54 }
  0x20   : > { %v284_v22 = vrot.slane %v235_v4, 1  ;;  %v787_v23 = vpack.c.bf16 %v1691_v9, %v1688_v5  ;;  %v1701_v24 = vsel %vm261_vm1, %v277_v2, %v278_v14  ;;  %1528 = vmatprep.subr.msk.bf16.mxu0 %vm313_vm0, %v1301_v12  ;;  %v1263_v26 = vcombine.low %v1625_v6, %v1631_v8  ;;  %v1285_v6 = vld [vmem:[%s1848_s1 + $0x6] sm:$0x3]  ;;  %v1311_v2 = vld [vmem:[%s1848_s1 + $0x10] sm:$0x3] }
  0x21   : > { %v1704_v25 = vsel %vm261_vm1, %v280_v15, %v281_v17  ;;  %v1716_v29 = vpack.c.bf16 %v1701_v24, %v276_v51  ;;  %v478_v31 = vrot.slane %v230_v59, 2  ;;  %v479_v32 = vrot.slane %v231_v61, 2  ;;  %v219_v14 = vld [vmem:[%s1622_s29 + $0x4c] sm:$0x1] }
  0x22   : > { %v1719_v30 = vsel %vm261_vm1, %v283_v19, %v284_v22  ;;  %1417 = vmatprep.mubr.msk.bf16.mxu0 %vm300_vm2, %v787_v23  ;;  %v481_v34 = vrot.slane %v232_v62, 2  ;;  %v482_v35 = vrot.slane %v233_v63, 2  ;;  %v474_v36 = vsel %vm462_vm3, %v472_v53, %v473_v56 }
  0x23   : > { %v1724_v33 = vpack.c.bf16 %v1719_v30, %v1704_v25  ;;  %1371 = vmatprep.mubr.msk.bf16.mxu1 %vm300_vm2, %v1716_v29  ;;  %v477_v37 = vsel %vm462_vm3, %v475_v20, %v476_v21  ;;  %v236_v38 = vunpack.c.l.bf16 %v1710_v27  ;;  %v237_v39 = vunpack.c.l.bf16 %v1713_v28 }
  0x24   : > { %v480_v41 = vsel %vm462_vm3, %v478_v31, %v479_v32  ;;  %v483_v42 = vsel %vm462_vm3, %v481_v34, %v482_v35  ;;  %v788_v43 = vpack.c.bf16 %v477_v37, %v474_v36  ;;  %v484_v45 = vrot.slane %v234_v0, 2  ;;  %v1317_v35 = vld [vmem:[%s1850_s3] ss:$0 sm:$0xff] }
  0x25   : > { %1372 = vmatmul.mubr.msk.bf16.gmra.mrb[4].mxu1 %vm300_vm2, %v1724_v33  ;;  %v789_v46 = vpack.c.bf16 %v483_v42, %v480_v41  ;;  %v485_v47 = vrot.slane %v235_v4, 2  ;;  %v783_v48 = vrot.slane %v236_v38, 2  ;;  %v784_v49 = vrot.slane %v237_v39, 2 }
  0x26   : > { %1377 = vmatprep.mubr.msk.bf16.mxu1 %vm300_vm2, %v1263_v26  ;;  %v1264_v51 = vcombine.low %v1638_v13, %v1642_v16  ;;  %v888_v53 = vsel %vm313_vm0, %v1301_v12, 0  ;;  %v1265_v54 = vcombine.low %v1646_v18, %v1660_v40  ;;  %v463_v56 = vrot.slane %v220_v10, 2 }
  0x27   : > { %v464_v57 = vrot.slane %v221_v11, 2  ;;  %v514_v58 = vsel %vm313_vm0, %v1276_v60, 0  ;;  %v486_v59 = vsel %vm462_vm3, %v484_v45, %v485_v47  ;;  %v1754_v61 = vsel %vm462_vm3, %v783_v48, %v784_v49 }
  0x28   : > { %v790_v7 = vpack.c.bf16 %v1754_v61, %v486_v59  ;;  %v1266_v11 = vcombine.low %v1664_v44, %v1671_v50  ;;  %v496_v62 = vpack.c.bf16 %v474_v36, %v1691_v9  ;;  %v976_v63 = vsel %vm313_vm0, %v1306_v55, 0 }
  0x29   : > { %v465_v10 = vsel %vm462_vm3, %v463_v56, %v464_v57  ;;  %v497_v0 = vpack.c.bf16 %v480_v41, %v477_v37  ;;  %v608_v4 = vsel %vm313_vm0, %v1285_v6, 0  ;;  %v498_v12 = vpack.c.bf16 %v486_v59, %v483_v42 }
  0x2a   : > { %1418 = vmatmul.mubr.msk.bf16.vlgmr.msra.gmra.mrb[0].mxu0 %vm300_vm2, %v788_v43  ;;  %v495_v60 = vpack.c.bf16 %v1688_v5, %v465_v10  ;;  %v218_v5 = vld [vmem:[%s1622_s29 + $0x48] sm:$0xf]  ;;  %v1281_v15 = vcombine.low %v1631_v8, %v1638_v13  ;;  %v239_v19 = vunpack.c.l.bf16 %v219_v14  ;;  %v685_v21 = vrot.slane %v236_v38, 1 }
  0x2b   : > { %1426 = vmatpush3.bf16.msra.mxu0 %v888_v53  ;;  %1421 = vmatprep.mubr.msk.bf16.mxu0 %vm300_vm2, %v789_v46  ;;  %v1300_v9 = vcombine.low %v1710_v27, %v218_v5  ;;  %v238_v17 = vunpack.c.l.bf16 %v218_v5  ;;  %v686_v22 = vrot.slane %v237_v39, 1  ;;  %v1282_v23 = vcombine.low %v1642_v16, %v1646_v18 }
  0x2c   : > { %1529 = vmatprep.subr.msk.bf16.mxu0 %vm313_vm0, %v1306_v55  ;;  %v1062_v8 = vsel %vm313_vm0, %v1311_v2, 0  ;;  %v1283_v13 = vcombine.low %v1660_v40, %v1664_v44  ;;  %v1284_v18 = vcombine.low %v1671_v50, %v1710_v27  ;;  %v691_v40 = vpack.c.bf16 %v1704_v25, %v1701_v24 }
  0x2d   : > { %1378 = vmatmul.mubr.msk.bf16.vlgmr.msra.gmra.mrb[0].mxu1 %vm300_vm2, %v1264_v51  ;;  %v965_v20 = vrot.slane %v238_v17, 1  ;;  %v1051_v44 = vrot.slane %v238_v17, 2 }
  0x2e   : > { %1386 = vmatpush3.bf16.msra.mxu1 %v514_v58  ;;  %1381 = vmatprep.mubr.msk.bf16.mxu1 %vm300_vm2, %v1265_v54 }
  0x2f   : > { %1524 = vmatprep.subr.msk.bf16.mxu1 %vm313_vm0, %v1285_v6 }
  0x32   : > { %1422 = vmatmul.mubr.msk.bf16.gmra.mrb[4].mxu0 %vm300_vm2, %v790_v7 }
  0x33   : > { %1427 = vmatprep.mubr.msk.bf16.mxu0 %vm300_vm2, %v1264_v51 }
  0x35   : > { %1382 = vmatmul.mubr.msk.bf16.gmra.mrb[4].mxu1 %vm300_vm2, %v1266_v11 }
  0x36   : > { %1387 = vmatprep.mubr.msk.bf16.mxu1 %vm300_vm2, %v495_v60 }
  0x3a   : > { %1428 = vmatmul.mubr.msk.bf16.vlgmr.msra.gmra.mrb[0].mxu0 %vm300_vm2, %v1265_v54 }
  0x3b   : > { %1436 = vmatpush3.bf16.msra.mxu0 %v976_v63  ;;  %1431 = vmatprep.mubr.msk.bf16.mxu0 %vm300_vm2, %v1266_v11 }
  0x3c   : > { %1530 = vmatprep.subr.msk.bf16.mxu0 %vm313_vm0, %v1311_v2 }
  0x3d   : > { %1388 = vmatmul.mubr.msk.bf16.vlgmr.msra.gmra.mrb[0].mxu1 %vm300_vm2, %v496_v62 }
  0x3e   : > { %1396 = vmatpush3.bf16.msra.mxu1 %v608_v4  ;;  %1391 = vmatprep.mubr.msk.bf16.mxu1 %vm300_vm2, %v497_v0 }
  0x3f   : > { %1526 = vmatprep.subr.msk.bf16.mxu1 %vm313_vm0, %v1598_v1  ;;  %v966_v1 = vrot.slane %v239_v19, 1 }
  0x41   : > { %v967_v26 = vsel %vm261_vm1, %v965_v20, %v966_v1 }
  0x42   : > { %1432 = vmatmul.mubr.msk.bf16.gmra.mrb[4].mxu0 %vm300_vm2, %v1300_v9 }
  0x43   : > { %1437 = vmatprep.mubr.msk.bf16.mxu0 %vm300_vm2, %v1674_v52  ;;  %v687_v52 = vsel %vm261_vm1, %v685_v21, %v686_v22 }
  0x44   : > { %v969_v16 = vpack.c.bf16 %v967_v26, %v687_v52  ;;  %v692_v27 = vpack.c.bf16 %v687_v52, %v1719_v30 }
  0x45   : > { %1392 = vmatmul.mubr.msk.bf16.gmra.mrb[4].mxu1 %vm300_vm2, %v498_v12 }
  0x46   : > { %1397 = vmatprep.mubr.msk.bf16.mxu1 %vm300_vm2, %v1281_v15 }
  0x4a   : > { %1438 = vmatmul.mubr.msk.bf16.vlgmr.msra.gmra.mrb[0].mxu0 %vm300_vm2, %v1716_v29 }
  0x4b   : > { %1446 = vmatpush3.bf16.msra.mxu0 %v1062_v8  ;;  %1441 = vmatprep.mubr.msk.bf16.mxu0 %vm300_vm2, %v1724_v33  ;;  %v1316_v33 = vld [vmem:[%s1849_s2] ss:$0 sm:$0xff] }
  0x4d   : > { %1398 = vmatmul.mubr.msk.bf16.vlgmr.msra.gmra.mrb[0].mxu1 %vm300_vm2, %v1282_v23 }
  0x4e   : > { %1456 = vmatpush3.bf16.msra.mxu1 %v1607_v3  ;;  %1401 = vmatprep.mubr.msk.bf16.mxu1 %vm300_vm2, %v1283_v13  ;;  %v1052_v3 = vrot.slane %v239_v19, 2 }
  0x50   : > { %v1053_v50 = vsel %vm462_vm3, %v1051_v44, %v1052_v3 }
  0x51   : > { %v1055_v24 = vpack.c.bf16 %v1053_v50, %v1754_v61 }
  0x52   : > { %1442 = vmatmul.mubr.msk.bf16.gmra.mrb[4].mxu0 %vm300_vm2, %v969_v16 }
  0x53   : > { %1447 = vmatprep.mubr.msk.bf16.mxu0 %vm300_vm2, %v496_v62 }
  0x55   : > { %1402 = vmatmul.mubr.msk.bf16.gmra.mrb[4].mxu1 %vm300_vm2, %v1284_v18 }
  0x56   : > { %1411 = vmatprep.mubr.msk.bf16.mxu1 %vm300_vm2, %v691_v40 }
  0x5a   : > { %1448 = vmatmul.mubr.msk.bf16.vlgmr.msra.gmra.mrb[0].mxu0 %vm300_vm2, %v497_v0 }
  0x5b   : > { %1451 = vmatprep.mubr.msk.bf16.mxu0 %vm300_vm2, %v498_v12 }
  0x61   : > { %1412 = vmatmul.mubr.msk.bf16.vlgmr.msra.gmra.mrb[4].mxu1 %vm300_vm2, %v692_v27 }
  0x62   : > { %1452 = vmatmul.mubr.msk.bf16.gmra.mrb[4].mxu0 %vm300_vm2, %v1055_v24 }
 0x120   : > { %v1399_v25 = vpop.f32.mrb[0].mxu1 }
 0x121   : > { %v644_v28 = vpop.f32.mrb[1].mxu1 }
 0x122   : > { %v1400_v29 = vpop.f32.mrb[2].mxu1 }
 0x123   : > { %v647_v31 = vpop.f32.mrb[3].mxu1 }
 0x12d   : > { %v1449_v32 = vpop.f32.mrb[0].mxu0 }
 0x12e   : > { %v1457_v34 = vadd.f32 %v1449_v32, %v1399_v25  ;;  %v1098_v30 = vpop.f32.mrb[1].mxu0 }
 0x12f   : > { %v1458_v36 = vadd.f32 %v1098_v30, %v644_v28  ;;  %v1450_v37 = vpop.f32.mrb[2].mxu0 }
 0x130   : > { %v1146_v38 = vmul.f32 %v1457_v34, %v1316_v33  ;;  %v1459_v39 = vadd.f32 %v1450_v37, %v1400_v29  ;;  %v1101_v41 = vpop.f32.mrb[3].mxu0 }
 0x131   : > { %v1144_v42 = vmul.f32 %v1458_v36, %v1316_v33  ;;  %v1460_v43 = vadd.f32 %v1101_v41, %v647_v31 }
 0x132   : > { %v1161_v45 = vadd.f32 %v1317_v35, %v1146_v38  ;;  %v1147_v46 = vmul.f32 %v1459_v39, %v1316_v33 }
 0x133   : > { %v1159_v47 = vadd.f32 %v1317_v35, %v1144_v42  ;;  %v1145_v48 = vmul.f32 %v1460_v43, %v1316_v33 }
 0x134   : > { %v1413_v49 = vpop.f32.mrb[4].mxu1  ;;  %vm1169_vm4 = vcmp.ge.f32.partialorder %v1161_v45, 0.0  ;;  %v1177_v51 = vmul.f32 0.01, %v1161_v45  ;;  %v1162_v53 = vadd.f32 %v1317_v35, %v1147_v46 }
 0x135   : > { %v760_v54 = vpop.f32.mrb[5].mxu1  ;;  %vm1167_vm5 = vcmp.ge.f32.partialorder %v1159_v47, 0.0  ;;  %v1175_v55 = vmul.f32 0.01, %v1159_v47  ;;  %v1160_v56 = vadd.f32 %v1317_v35, %v1145_v48  ;;  %v1453_v57 = vpop.f32.mrb[4].mxu0 }
 0x136   : > { %v1414_v58 = vpop.f32.mrb[6].mxu1  ;;  %v1185_v59 = vsel %vm1169_vm4, %v1161_v45, %v1177_v51  ;;  %vm1170_vm6 = vcmp.ge.f32.partialorder %v1162_v53, 0.0  ;;  %v1178_v61 = vmul.f32 0.01, %v1162_v53  ;;  %v1461_v6 = vadd.f32 %v1453_v57, %v1413_v49  ;;  %v1114_v7 = vpop.f32.mrb[5].mxu0 }
 0x137   : > { %v763_v10 = vpop.f32.mrb[7].mxu1  ;;  %1193 = vst [vmem:[%s1834_s23 + $0x10] sm:$0xff] %v1185_v59  ;;  %v1183_v11 = vsel %vm1167_vm5, %v1159_v47, %v1175_v55  ;;  %vm1168_vm7 = vcmp.ge.f32.partialorder %v1160_v56, 0.0  ;;  %v1176_v60 = vmul.f32 0.01, %v1160_v56  ;;  %v1462_v62 = vadd.f32 %v1114_v7, %v760_v54  ;;  %v1454_v63 = vpop.f32.mrb[6].mxu0 }
 0x138   : > { %1191 = vst [vmem:[%s1834_s23] sm:$0xff] %v1183_v11  ;;  %v1186_v0 = vsel %vm1170_vm6, %v1162_v53, %v1178_v61  ;;  %v1150_v2 = vmul.f32 %v1461_v6, %v1316_v33  ;;  %v1463_v4 = vadd.f32 %v1454_v63, %v1414_v58  ;;  %v1117_v5 = vpop.f32.mrb[7].mxu0 }
 0x139   : > { %1194 = vst [vmem:[%s1834_s23 + $0x18] sm:$0xff] %v1186_v0  ;;  %v1184_v9 = vsel %vm1168_vm7, %v1160_v56, %v1176_v60  ;;  %v1148_v12 = vmul.f32 %v1462_v62, %v1316_v33  ;;  %v1464_v14 = vadd.f32 %v1117_v5, %v763_v10 }
 0x13a   : > { %1192 = vst [vmem:[%s1834_s23 + $0x8] sm:$0xff] %v1184_v9  ;;  %v1165_v15 = vadd.f32 %v1317_v35, %v1150_v2  ;;  %v1151_v17 = vmul.f32 %v1463_v4, %v1316_v33 }
 0x13b   : > { %v1163_v19 = vadd.f32 %v1317_v35, %v1148_v12  ;;  %v1149_v20 = vmul.f32 %v1464_v14, %v1316_v33 }
 0x13c   : > { %vm1173_vm8 = vcmp.ge.f32.partialorder %v1165_v15, 0.0  ;;  %v1181_v21 = vmul.f32 0.01, %v1165_v15  ;;  %v1166_v22 = vadd.f32 %v1317_v35, %v1151_v17 }
 0x13d   : > { %vm1171_vm9 = vcmp.ge.f32.partialorder %v1163_v19, 0.0  ;;  %v1179_v1 = vmul.f32 0.01, %v1163_v19  ;;  %v1164_v23 = vadd.f32 %v1317_v35, %v1149_v20 }
 0x13e   : > { %v1189_v8 = vsel %vm1173_vm8, %v1165_v15, %v1181_v21  ;;  %vm1174_vm10 = vcmp.ge.f32.partialorder %v1166_v22, 0.0  ;;  %v1182_v13 = vmul.f32 0.01, %v1166_v22 }
 0x13f   : > { %1197 = vst [vmem:[%s1834_s23 + $0x30] sm:$0xff] %v1189_v8  ;;  %v1187_v52 = vsel %vm1171_vm9, %v1163_v19, %v1179_v1  ;;  %vm1172_vm11 = vcmp.ge.f32.partialorder %v1164_v23, 0.0  ;;  %v1180_v26 = vmul.f32 0.01, %v1164_v23 }
 0x140   : > { %1195 = vst [vmem:[%s1834_s23 + $0x20] sm:$0xff] %v1187_v52  ;;  %v1190_v16 = vsel %vm1174_vm10, %v1166_v22, %v1182_v13 }
 0x141   : > { %1198 = vst [vmem:[%s1834_s23 + $0x38] sm:$0xff] %v1190_v16  ;;  %v1188_v18 = vsel %vm1172_vm11, %v1164_v23, %v1180_v26 }
 0x142   : > { %1196 = vst [vmem:[%s1834_s23 + $0x28] sm:$0xff] %v1188_v18 }
 0x143 PF: > { %s14_s15 = sadd.s32 1, %s1555_s15  }
 0x144   : > { %p11_p5 = scmp.ge.s32.totalorder %s14_s15, 4  }
 0x146   :  { %13 = sbr.rel (!%p11_p5) target bundleno = 1 (0x1), region = 74 }

</bundles_post_ra>
